<compile_context>
chip_gen: v6e
topology: v6e:2x2x1
jax: 0.10.0
libtpu: 0.0.40
codegen_flags: <defaults>
</compile_context>

<pallas_src>
import functools
import jax
import jax.numpy as jnp
from jax.experimental import pallas as pl
from jax.experimental.pallas import tpu as pltpu

BN_EPS = 1e-5


def _round_up(v, m):
    return ((v + m - 1) // m) * m


def _choose_tm(m_rows):
    """Largest M tile that still leaves >=4 grid steps (megacore-friendly)."""
    for tm in (512, 256, 128):
        if m_rows >= 4 * tm:
            return tm
    return min(512, _round_up(m_rows, 8))


# ----------------------------------------------------------------------------
# Pallas kernel: fused (patches @ scaled_weights) + bias -> activation
# ----------------------------------------------------------------------------
def _fused_conv_matmul_kernel(x_ref, w_ref, b_ref, o_ref, *, activation):
    acc = jnp.dot(x_ref[...], w_ref[...], preferred_element_type=jnp.float32)
    y = acc + b_ref[...]
    if activation == "relu":
        y = jnp.maximum(y, 0.0)
    elif activation == "tanh":
        y = jnp.tanh(y)
    o_ref[...] = y


def fused_matmul(patches, w_mat, bias, activation):
    """patches: (M, K) f32, w_mat: (K, Cout) f32 (BN scale pre-folded),
    bias: (Cout,) f32."""
    M, K = patches.shape
    _, cout = w_mat.shape

    tm = _choose_tm(M)
    m_pad = _round_up(M, tm)
    k_pad = _round_up(K, 128)
    lane = 128 if cout <= 128 else 256          # wider N tile for v6e/v7x MXU
    n_pad = _round_up(cout, lane)

    # bf16 MXU operands (f32 accumulation inside the kernel).
    x = jnp.pad(patches, ((0, m_pad - M), (0, k_pad - K))).astype(jnp.bfloat16)
    w = jnp.pad(w_mat, ((0, k_pad - K), (0, n_pad - cout))).astype(jnp.bfloat16)
    b = jnp.pad(bias.reshape(1, -1), ((0, 0), (0, n_pad - cout))).astype(
        jnp.float32)

    kernel = functools.partial(_fused_conv_matmul_kernel, activation=activation)
    cost = pl.CostEstimate(
        flops=2 * m_pad * k_pad * n_pad,
        transcendentals=m_pad * n_pad if activation == "tanh" else 0,
        bytes_accessed=m_pad * k_pad * 2 + k_pad * n_pad * 2 + m_pad * n_pad * 4,
    )
    out = pl.pallas_call(
        kernel,
        out_shape=jax.ShapeDtypeStruct((m_pad, n_pad), jnp.float32),
        grid=(m_pad // tm,),
        in_specs=[
            pl.BlockSpec((tm, k_pad), lambda i: (i, 0)),
            pl.BlockSpec((k_pad, n_pad), lambda i: (0, 0)),
            pl.BlockSpec((1, n_pad), lambda i: (0, 0)),
        ],
        out_specs=pl.BlockSpec((tm, n_pad), lambda i: (i, 0)),
        compiler_params=pltpu.CompilerParams(
            dimension_semantics=("parallel",)),
        cost_estimate=cost,
    )(x, w, b)
    return out[:M, :cout]


# ----------------------------------------------------------------------------
# Conv / ConvTranspose wrappers (im2col glue in plain JAX)
# ----------------------------------------------------------------------------
def _im2col(x, kh, kw, stride, dilation, padding):
    """x: (N, H, W, C) -> patches (N, oh, ow, kh*kw*C), ordering (kh, kw, C)."""
    n, h, w, c = x.shape
    xp = jnp.pad(x, ((0, 0), (padding, padding), (padding, padding), (0, 0)))
    hp, wp = h + 2 * padding, w + 2 * padding
    oh = (hp - dilation * (kh - 1) - 1) // stride + 1
    ow = (wp - dilation * (kw - 1) - 1) // stride + 1
    cols = []
    for i in range(kh):
        for j in range(kw):
            r0, c0 = i * dilation, j * dilation
            patch = xp[:, r0: r0 + stride * (oh - 1) + 1: stride,
                          c0: c0 + stride * (ow - 1) + 1: stride, :]
            cols.append(patch)
    return jnp.concatenate(cols, axis=-1), oh, ow


def conv2d_pallas(x_nhwc, weight_oihw, scale, bias, stride, padding, dilation,
                  activation):
    n, h, w, cin = x_nhwc.shape
    cout, _, kh, kw = weight_oihw.shape
    patches, oh, ow = _im2col(x_nhwc, kh, kw, stride, dilation, padding)
    pm = patches.reshape(n * oh * ow, kh * kw * cin)
    wm = jnp.transpose(weight_oihw, (2, 3, 1, 0)).reshape(kh * kw * cin, cout)
    wm = wm * scale[None, :]   # fold BN scale into weights (one-off, off hot path)
    out = fused_matmul(pm, wm, bias, activation)
    return out.reshape(n, oh, ow, cout)


def conv_transpose2d_pallas(x_nhwc, weight_iohw, scale, bias, stride, padding,
                            activation):
    # PyTorch ConvTranspose2d weight layout: (Cin, Cout, KH, KW).
    cin, cout, kh, kw = weight_iohw.shape
    n, h, w, _ = x_nhwc.shape

    if stride == 2 and kh == 4 and kw == 4 and padding == 1:
        # Sub-pixel (phase) decomposition: out[2u+py, 2v+px] is a 2x2 conv of
        # the un-dilated input with a phase-specific sub-kernel. Avoids the
        # 75%-zero dilated input of the naive lowering.
        # Phase py -> kernel taps used for input rows (u-1?/u/u+1):
        #   py=0: out = x[u-1]*W[...,3,:] + x[u]*W[...,1,:]
        #   py=1: out = x[u]  *W[...,2,:] + x[u+1]*W[...,0,:]
        tap = {0: (3, 1), 1: (2, 0)}  # phase -> (tap for slot i=0, slot i=1)
        xp = jnp.pad(x_nhwc, ((0, 0), (1, 1), (1, 1), (0, 0)))
        rows = []
        for py in (0, 1):
            cols = []
            for px in (0, 1):
                kys, kxs = tap[py], tap[px]
                # wd[co, ci, i, j] = W[ci, co, kys[i], kxs[j]]
                wd = jnp.stack(
                    [jnp.stack([weight_iohw[:, :, kys[i], kxs[j]]
                                for j in range(2)], axis=-1)
                     for i in range(2)], axis=-2)          # (cin, cout, 2, 2)
                wd = jnp.transpose(wd, (1, 0, 2, 3))       # OIHW
                xs = xp[:, py:py + h + 1, px:px + w + 1, :]
                ph = conv2d_pallas(xs, wd, scale, bias, stride=1, padding=0,
                                   dilation=1, activation=activation)
                cols.append(ph)                            # (n, h, w, cout)
            rows.append(jnp.stack(cols, axis=3))           # (n, h, w, 2, cout)
        y = jnp.stack(rows, axis=2)                        # (n, h, 2, w, 2, cout)
        return y.reshape(n, 2 * h, 2 * w, cout)

    # Generic fallback: zero-stuffed-input equivalent direct conv.
    # TODO(synk): assumes output_padding=0 and dilation=1.
    w_eq = jnp.transpose(weight_iohw[:, :, ::-1, ::-1], (1, 0, 2, 3))
    x_dil = jnp.zeros((n, (h - 1) * stride + 1, (w - 1) * stride + 1, cin),
                      x_nhwc.dtype)
    x_dil = x_dil.at[:, ::stride, ::stride, :].set(x_nhwc)
    pad_eq = kh - 1 - padding
    return conv2d_pallas(x_dil, w_eq, scale, bias, stride=1, padding=pad_eq,
                         dilation=1, activation=activation)


# ----------------------------------------------------------------------------
# _netG model definition (layer configs + deterministic synthetic params)
# ----------------------------------------------------------------------------
def _c(cin, cout, k, s, p, d, bias, bn, act):
    return dict(kind="conv", cin=cin, cout=cout, k=k, stride=s, pad=p, dil=d,
                bias=bias, bn=bn, act=act)


def _ct(cin, cout, k, s, p, bn, act):
    return dict(kind="convT", cin=cin, cout=cout, k=k, stride=s, pad=p, dil=1,
                bias=True, bn=bn, act=act)


def build_configs(nef, nc):
    cfgs = [
        _c(4, nef, 5, 1, 1, 1, False, True, "relu"),
        _c(nef, nef * 2, 3, 2, 1, 1, False, True, "relu"),
        _c(nef * 2, nef * 2, 3, 1, 1, 1, False, True, "relu"),
        _c(nef * 2, nef * 4, 3, 2, 1, 1, False, True, "relu"),
        _c(nef * 4, nef * 4, 3, 1, 1, 1, False, True, "relu"),
        _c(nef * 4, nef * 4, 3, 1, 1, 1, False, True, "relu"),
    ]
    for d in (2, 4, 8, 16):  # dilated convs (bias=True by PyTorch default)
        cfgs.append(_c(nef * 4, nef * 4, 3, 1, d, d, True, True, "relu"))
    cfgs += [
        _c(nef * 4, nef * 4, 3, 1, 1, 1, False, True, "relu"),
        _c(nef * 4, nef * 4, 3, 1, 1, 1, False, True, "relu"),
        _ct(nef * 4, nef * 2, 4, 2, 1, True, "relu"),
        _c(nef * 2, nef * 2, 3, 1, 1, 1, False, True, "relu"),
        _ct(nef * 2, nef, 4, 2, 1, True, "relu"),
        _c(nef, nef // 2, 3, 1, 1, 1, False, True, "relu"),
        _c(nef // 2, nc, 3, 1, 1, 1, False, False, "tanh"),
    ]
    return cfgs


def init_params(key, cfgs):
    params = []
    for cfg in cfgs:
        key, k0, k1, k2, k3, k4, k5 = jax.random.split(key, 7)
        cin, cout, k = cfg["cin"], cfg["cout"], cfg["k"]
        if cfg["kind"] == "conv":
            w = 0.05 * jax.random.normal(k0, (cout, cin, k, k), jnp.float32)
        else:  # ConvTranspose2d weight layout: (Cin, Cout, KH, KW)
            w = 0.05 * jax.random.normal(k0, (cin, cout, k, k), jnp.float32)
        cb = (0.05 * jax.random.normal(k1, (cout,), jnp.float32)
              if cfg["bias"] else jnp.zeros((cout,), jnp.float32))
        gamma = 1.0 + 0.1 * jax.random.normal(k2, (cout,), jnp.float32)
        beta = 0.1 * jax.random.normal(k3, (cout,), jnp.float32)
        rmean = 0.1 * jax.random.normal(k4, (cout,), jnp.float32)
        rvar = 1.0 + 0.5 * jax.random.uniform(k5, (cout,), jnp.float32)
        params.append((w, cb, gamma, beta, rmean, rvar))
    return params


def netG_forward(x_nchw, cfgs, params):
    x = jnp.transpose(x_nchw, (0, 2, 3, 1)).astype(jnp.float32)  # NCHW -> NHWC
    for cfg, (w, cb, gamma, beta, rmean, rvar) in zip(cfgs, params):
        if cfg["bn"]:
            scale = gamma / jnp.sqrt(rvar + BN_EPS)
            bias = beta + (cb - rmean) * scale
        else:
            scale = jnp.ones((cfg["cout"],), jnp.float32)
            bias = cb
        if cfg["kind"] == "conv":
            x = conv2d_pallas(x, w, scale, bias, cfg["stride"], cfg["pad"],
                              cfg["dil"], cfg["act"])
        else:
            x = conv_transpose2d_pallas(x, w, scale, bias, cfg["stride"],
                                        cfg["pad"], cfg["act"])
    return jnp.transpose(x, (0, 3, 1, 2))  # NHWC -> NCHW


# ----------------------------------------------------------------------------
if __name__ == "__main__":
    nef, nc = 8, 3                      # opt.nef, opt.nc (small for the demo)
    batch, in_c, h, w = 2, 4, 18, 18    # input is 4-channel (image + mask)

    cfgs = build_configs(nef, nc)
    params = init_params(jax.random.PRNGKey(0), cfgs)

    x = jax.random.normal(jax.random.PRNGKey(1), (batch, in_c, h, w),
                          jnp.float32)

    fwd = jax.jit(lambda xx, pp: netG_forward(xx, cfgs, pp))
    out = fwd(x, params)
    out = jax.block_until_ready(out)

    # sanity: output is (N, nc, 16, 16) in [-1, 1] (tanh)
    assert out.shape == (batch, nc, 16, 16)
    assert bool(jnp.all(jnp.isfinite(out)))
    assert float(jnp.max(jnp.abs(out))) <= 1.0 + 1e-5

    print("KERNEL_OK")
</pallas_src>

<mosaic_0001>
module attributes {stable_mosaic.version = 11 : i64} {
  func.func @_fused_conv_matmul_kernel(%arg0: i32, %arg1: memref<128x128xbf16, #tpu.memory_space<vmem>>, %arg2: memref<128x128xbf16, #tpu.memory_space<vmem>>, %arg3: memref<1x128xf32, #tpu.memory_space<vmem>>, %arg4: memref<128x128xf32, #tpu.memory_space<vmem>>) attributes {dimension_semantics = [#tpu.dimension_semantics<parallel>], iteration_bounds = array<i64: 4>, scalar_prefetch = 0 : i64, scratch_operands = 0 : i64, tpu.core_type = #tpu.core_type<tc>, window_params = [{transform_indices = @transform_0, window_bounds = array<i64: 128, 128>}, {pipeline_mode = #tpu.pipeline_mode<synchronous>, transform_indices = @transform_1, window_bounds = array<i64: 128, 128>}, {pipeline_mode = #tpu.pipeline_mode<synchronous>, transform_indices = @transform_2, window_bounds = array<i64: 1, 128>}, {transform_indices = @transform_3, window_bounds = array<i64: 128, 128>}]} {
    %c0 = arith.constant 0 : index
    %c0_0 = arith.constant 0 : index
    %0 = vector.load %arg1[%c0, %c0_0] : memref<128x128xbf16, #tpu.memory_space<vmem>>, vector<128x128xbf16>
    %c0_1 = arith.constant 0 : index
    %c0_2 = arith.constant 0 : index
    %1 = vector.load %arg2[%c0_1, %c0_2] : memref<128x128xbf16, #tpu.memory_space<vmem>>, vector<128x128xbf16>
    %cst = arith.constant dense<0.000000e+00> : vector<128x128xf32>
    %2 = tpu.matmul %0, %1, %cst {dimension_numbers = #tpu.dot_dimension_numbers<[1], [0], [0], [1], [0, 0, 1, 1], [], []>} : vector<128x128xbf16>, vector<128x128xbf16>, vector<128x128xf32> -> vector<128x128xf32>
    %c0_3 = arith.constant 0 : index
    %c0_4 = arith.constant 0 : index
    %3 = vector.load %arg3[%c0_3, %c0_4] : memref<1x128xf32, #tpu.memory_space<vmem>>, vector<1x128xf32>
    %4 = vector.broadcast %3 : vector<1x128xf32> to vector<128x128xf32>
    %5 = arith.addf %2, %4 : vector<128x128xf32>
    %cst_5 = arith.constant 0.000000e+00 : f32
    %6 = vector.broadcast %cst_5 : f32 to vector<128x128xf32>
    %7 = arith.maximumf %5, %6 : vector<128x128xf32>
    %c0_6 = arith.constant 0 : index
    %c0_7 = arith.constant 0 : index
    %8 = vector.load %arg4[%c0_6, %c0_7] : memref<128x128xf32, #tpu.memory_space<vmem>>, vector<128x128xf32>
    tpu.vector_store %arg4[%c0_6, %c0_7], %7 {strides = array<i32>} : memref<128x128xf32, #tpu.memory_space<vmem>>, vector<128x128xf32>,
    return
  }
  func.func @transform_0(%arg0: i32) -> (i32, i32) {
    %c0_i32 = arith.constant 0 : i32
    %c0_i32_0 = arith.constant 0 : i32
    return %arg0, %c0_i32 : i32, i32
  }
  func.func @transform_1(%arg0: i32) -> (i32, i32) {
    %c0_i32 = arith.constant 0 : i32
    %c0_i32_0 = arith.constant 0 : i32
    %c0_i32_1 = arith.constant 0 : i32
    return %c0_i32, %c0_i32_0 : i32, i32
  }
  func.func @transform_2(%arg0: i32) -> (i32, i32) {
    %c0_i32 = arith.constant 0 : i32
    %c0_i32_0 = arith.constant 0 : i32
    %c0_i32_1 = arith.constant 0 : i32
    return %c0_i32, %c0_i32_0 : i32, i32
  }
  func.func @transform_3(%arg0: i32) -> (i32, i32) {
    %c0_i32 = arith.constant 0 : i32
    %c0_i32_0 = arith.constant 0 : i32
    return %arg0, %c0_i32 : i32, i32
  }
}

module attributes {stable_mosaic.version = 11 : i64} {
  func.func @_fused_conv_matmul_kernel(%arg0: i32, %arg1: memref<128x128xbf16, #tpu.memory_space<vmem>>, %arg2: memref<128x128xbf16, #tpu.memory_space<vmem>>, %arg3: memref<1x128xf32, #tpu.memory_space<vmem>>, %arg4: memref<128x128xf32, #tpu.memory_space<vmem>>) attributes {dimension_semantics = [#tpu.dimension_semantics<parallel>], iteration_bounds = array<i64: 1>, scalar_prefetch = 0 : i64, scratch_operands = 0 : i64, tpu.core_type = #tpu.core_type<tc>, window_params = [{transform_indices = @transform_0, window_bounds = array<i64: 128, 128>}, {pipeline_mode = #tpu.pipeline_mode<synchronous>, transform_indices = @transform_1, window_bounds = array<i64: 128, 128>}, {pipeline_mode = #tpu.pipeline_mode<synchronous>, transform_indices = @transform_2, window_bounds = array<i64: 1, 128>}, {transform_indices = @transform_3, window_bounds = array<i64: 128, 128>}]} {
    %c0 = arith.constant 0 : index
    %c0_0 = arith.constant 0 : index
    %0 = vector.load %arg1[%c0, %c0_0] : memref<128x128xbf16, #tpu.memory_space<vmem>>, vector<128x128xbf16>
    %c0_1 = arith.constant 0 : index
    %c0_2 = arith.constant 0 : index
    %1 = vector.load %arg2[%c0_1, %c0_2] : memref<128x128xbf16, #tpu.memory_space<vmem>>, vector<128x128xbf16>
    %cst = arith.constant dense<0.000000e+00> : vector<128x128xf32>
    %2 = tpu.matmul %0, %1, %cst {dimension_numbers = #tpu.dot_dimension_numbers<[1], [0], [0], [1], [0, 0, 1, 1], [], []>} : vector<128x128xbf16>, vector<128x128xbf16>, vector<128x128xf32> -> vector<128x128xf32>
    %c0_3 = arith.constant 0 : index
    %c0_4 = arith.constant 0 : index
    %3 = vector.load %arg3[%c0_3, %c0_4] : memref<1x128xf32, #tpu.memory_space<vmem>>, vector<1x128xf32>
    %4 = vector.broadcast %3 : vector<1x128xf32> to vector<128x128xf32>
    %5 = arith.addf %2, %4 : vector<128x128xf32>
    %cst_5 = arith.constant 0.000000e+00 : f32
    %6 = vector.broadcast %cst_5 : f32 to vector<128x128xf32>
    %7 = arith.maximumf %5, %6 : vector<128x128xf32>
    %c0_6 = arith.constant 0 : index
    %c0_7 = arith.constant 0 : index
    %8 = vector.load %arg4[%c0_6, %c0_7] : memref<128x128xf32, #tpu.memory_space<vmem>>, vector<128x128xf32>
    tpu.vector_store %arg4[%c0_6, %c0_7], %7 {strides = array<i32>} : memref<128x128xf32, #tpu.memory_space<vmem>>, vector<128x128xf32>,
    return
  }
  func.func @transform_0(%arg0: i32) -> (i32, i32) {
    %c0_i32 = arith.constant 0 : i32
    %c0_i32_0 = arith.constant 0 : i32
    return %arg0, %c0_i32 : i32, i32
  }
  func.func @transform_1(%arg0: i32) -> (i32, i32) {
    %c0_i32 = arith.constant 0 : i32
    %c0_i32_0 = arith.constant 0 : i32
    %c0_i32_1 = arith.constant 0 : i32
    return %c0_i32, %c0_i32_0 : i32, i32
  }
  func.func @transform_2(%arg0: i32) -> (i32, i32) {
    %c0_i32 = arith.constant 0 : i32
    %c0_i32_0 = arith.constant 0 : i32
    %c0_i32_1 = arith.constant 0 : i32
    return %c0_i32, %c0_i32_0 : i32, i32
  }
  func.func @transform_3(%arg0: i32) -> (i32, i32) {
    %c0_i32 = arith.constant 0 : i32
    %c0_i32_0 = arith.constant 0 : i32
    return %arg0, %c0_i32 : i32, i32
  }
}

module attributes {stable_mosaic.version = 11 : i64} {
  func.func @_fused_conv_matmul_kernel(%arg0: i32, %arg1: memref<128x256xbf16, #tpu.memory_space<vmem>>, %arg2: memref<256x128xbf16, #tpu.memory_space<vmem>>, %arg3: memref<1x128xf32, #tpu.memory_space<vmem>>, %arg4: memref<128x128xf32, #tpu.memory_space<vmem>>) attributes {dimension_semantics = [#tpu.dimension_semantics<parallel>], iteration_bounds = array<i64: 1>, scalar_prefetch = 0 : i64, scratch_operands = 0 : i64, tpu.core_type = #tpu.core_type<tc>, window_params = [{transform_indices = @transform_0, window_bounds = array<i64: 128, 256>}, {pipeline_mode = #tpu.pipeline_mode<synchronous>, transform_indices = @transform_1, window_bounds = array<i64: 256, 128>}, {pipeline_mode = #tpu.pipeline_mode<synchronous>, transform_indices = @transform_2, window_bounds = array<i64: 1, 128>}, {transform_indices = @transform_3, window_bounds = array<i64: 128, 128>}]} {
    %c0 = arith.constant 0 : index
    %c0_0 = arith.constant 0 : index
    %0 = vector.load %arg1[%c0, %c0_0] : memref<128x256xbf16, #tpu.memory_space<vmem>>, vector<128x256xbf16>
    %c0_1 = arith.constant 0 : index
    %c0_2 = arith.constant 0 : index
    %1 = vector.load %arg2[%c0_1, %c0_2] : memref<256x128xbf16, #tpu.memory_space<vmem>>, vector<256x128xbf16>
    %cst = arith.constant dense<0.000000e+00> : vector<128x128xf32>
    %2 = tpu.matmul %0, %1, %cst {dimension_numbers = #tpu.dot_dimension_numbers<[1], [0], [0], [1], [0, 0, 1, 1], [], []>} : vector<128x256xbf16>, vector<256x128xbf16>, vector<128x128xf32> -> vector<128x128xf32>
    %c0_3 = arith.constant 0 : index
    %c0_4 = arith.constant 0 : index
    %3 = vector.load %arg3[%c0_3, %c0_4] : memref<1x128xf32, #tpu.memory_space<vmem>>, vector<1x128xf32>
    %4 = vector.broadcast %3 : vector<1x128xf32> to vector<128x128xf32>
    %5 = arith.addf %2, %4 : vector<128x128xf32>
    %cst_5 = arith.constant 0.000000e+00 : f32
    %6 = vector.broadcast %cst_5 : f32 to vector<128x128xf32>
    %7 = arith.maximumf %5, %6 : vector<128x128xf32>
    %c0_6 = arith.constant 0 : index
    %c0_7 = arith.constant 0 : index
    %8 = vector.load %arg4[%c0_6, %c0_7] : memref<128x128xf32, #tpu.memory_space<vmem>>, vector<128x128xf32>
    tpu.vector_store %arg4[%c0_6, %c0_7], %7 {strides = array<i32>} : memref<128x128xf32, #tpu.memory_space<vmem>>, vector<128x128xf32>,
    return
  }
  func.func @transform_0(%arg0: i32) -> (i32, i32) {
    %c0_i32 = arith.constant 0 : i32
    %c0_i32_0 = arith.constant 0 : i32
    return %arg0, %c0_i32 : i32, i32
  }
  func.func @transform_1(%arg0: i32) -> (i32, i32) {
    %c0_i32 = arith.constant 0 : i32
    %c0_i32_0 = arith.constant 0 : i32
    %c0_i32_1 = arith.constant 0 : i32
    return %c0_i32, %c0_i32_0 : i32, i32
  }
  func.func @transform_2(%arg0: i32) -> (i32, i32) {
    %c0_i32 = arith.constant 0 : i32
    %c0_i32_0 = arith.constant 0 : i32
    %c0_i32_1 = arith.constant 0 : i32
    return %c0_i32, %c0_i32_0 : i32, i32
  }
  func.func @transform_3(%arg0: i32) -> (i32, i32) {
    %c0_i32 = arith.constant 0 : i32
    %c0_i32_0 = arith.constant 0 : i32
    return %arg0, %c0_i32 : i32, i32
  }
}

module attributes {stable_mosaic.version = 11 : i64} {
  func.func @_fused_conv_matmul_kernel(%arg0: i32, %arg1: memref<32x256xbf16, #tpu.memory_space<vmem>>, %arg2: memref<256x128xbf16, #tpu.memory_space<vmem>>, %arg3: memref<1x128xf32, #tpu.memory_space<vmem>>, %arg4: memref<32x128xf32, #tpu.memory_space<vmem>>) attributes {dimension_semantics = [#tpu.dimension_semantics<parallel>], iteration_bounds = array<i64: 1>, scalar_prefetch = 0 : i64, scratch_operands = 0 : i64, tpu.core_type = #tpu.core_type<tc>, window_params = [{transform_indices = @transform_0, window_bounds = array<i64: 32, 256>}, {pipeline_mode = #tpu.pipeline_mode<synchronous>, transform_indices = @transform_1, window_bounds = array<i64: 256, 128>}, {pipeline_mode = #tpu.pipeline_mode<synchronous>, transform_indices = @transform_2, window_bounds = array<i64: 1, 128>}, {transform_indices = @transform_3, window_bounds = array<i64: 32, 128>}]} {
    %c0 = arith.constant 0 : index
    %c0_0 = arith.constant 0 : index
    %0 = vector.load %arg1[%c0, %c0_0] : memref<32x256xbf16, #tpu.memory_space<vmem>>, vector<32x256xbf16>
    %c0_1 = arith.constant 0 : index
    %c0_2 = arith.constant 0 : index
    %1 = vector.load %arg2[%c0_1, %c0_2] : memref<256x128xbf16, #tpu.memory_space<vmem>>, vector<256x128xbf16>
    %cst = arith.constant dense<0.000000e+00> : vector<32x128xf32>
    %2 = tpu.matmul %0, %1, %cst {dimension_numbers = #tpu.dot_dimension_numbers<[1], [0], [0], [1], [0, 0, 1, 1], [], []>} : vector<32x256xbf16>, vector<256x128xbf16>, vector<32x128xf32> -> vector<32x128xf32>
    %c0_3 = arith.constant 0 : index
    %c0_4 = arith.constant 0 : index
    %3 = vector.load %arg3[%c0_3, %c0_4] : memref<1x128xf32, #tpu.memory_space<vmem>>, vector<1x128xf32>
    %4 = vector.broadcast %3 : vector<1x128xf32> to vector<32x128xf32>
    %5 = arith.addf %2, %4 : vector<32x128xf32>
    %cst_5 = arith.constant 0.000000e+00 : f32
    %6 = vector.broadcast %cst_5 : f32 to vector<32x128xf32>
    %7 = arith.maximumf %5, %6 : vector<32x128xf32>
    %c0_6 = arith.constant 0 : index
    %c0_7 = arith.constant 0 : index
    %8 = vector.load %arg4[%c0_6, %c0_7] : memref<32x128xf32, #tpu.memory_space<vmem>>, vector<32x128xf32>
    tpu.vector_store %arg4[%c0_6, %c0_7], %7 {strides = array<i32>} : memref<32x128xf32, #tpu.memory_space<vmem>>, vector<32x128xf32>,
    return
  }
  func.func @transform_0(%arg0: i32) -> (i32, i32) {
    %c0_i32 = arith.constant 0 : i32
    %c0_i32_0 = arith.constant 0 : i32
    return %arg0, %c0_i32 : i32, i32
  }
  func.func @transform_1(%arg0: i32) -> (i32, i32) {
    %c0_i32 = arith.constant 0 : i32
    %c0_i32_0 = arith.constant 0 : i32
    %c0_i32_1 = arith.constant 0 : i32
    return %c0_i32, %c0_i32_0 : i32, i32
  }
  func.func @transform_2(%arg0: i32) -> (i32, i32) {
    %c0_i32 = arith.constant 0 : i32
    %c0_i32_0 = arith.constant 0 : i32
    %c0_i32_1 = arith.constant 0 : i32
    return %c0_i32, %c0_i32_0 : i32, i32
  }
  func.func @transform_3(%arg0: i32) -> (i32, i32) {
    %c0_i32 = arith.constant 0 : i32
    %c0_i32_0 = arith.constant 0 : i32
    return %arg0, %c0_i32 : i32, i32
  }
}

module attributes {stable_mosaic.version = 11 : i64} {
  func.func @_fused_conv_matmul_kernel(%arg0: i32, %arg1: memref<32x384xbf16, #tpu.memory_space<vmem>>, %arg2: memref<384x128xbf16, #tpu.memory_space<vmem>>, %arg3: memref<1x128xf32, #tpu.memory_space<vmem>>, %arg4: memref<32x128xf32, #tpu.memory_space<vmem>>) attributes {dimension_semantics = [#tpu.dimension_semantics<parallel>], iteration_bounds = array<i64: 1>, scalar_prefetch = 0 : i64, scratch_operands = 0 : i64, tpu.core_type = #tpu.core_type<tc>, window_params = [{transform_indices = @transform_0, window_bounds = array<i64: 32, 384>}, {pipeline_mode = #tpu.pipeline_mode<synchronous>, transform_indices = @transform_1, window_bounds = array<i64: 384, 128>}, {pipeline_mode = #tpu.pipeline_mode<synchronous>, transform_indices = @transform_2, window_bounds = array<i64: 1, 128>}, {transform_indices = @transform_3, window_bounds = array<i64: 32, 128>}]} {
    %c0 = arith.constant 0 : index
    %c0_0 = arith.constant 0 : index
    %0 = vector.load %arg1[%c0, %c0_0] : memref<32x384xbf16, #tpu.memory_space<vmem>>, vector<32x384xbf16>
    %c0_1 = arith.constant 0 : index
    %c0_2 = arith.constant 0 : index
    %1 = vector.load %arg2[%c0_1, %c0_2] : memref<384x128xbf16, #tpu.memory_space<vmem>>, vector<384x128xbf16>
    %cst = arith.constant dense<0.000000e+00> : vector<32x128xf32>
    %2 = tpu.matmul %0, %1, %cst {dimension_numbers = #tpu.dot_dimension_numbers<[1], [0], [0], [1], [0, 0, 1, 1], [], []>} : vector<32x384xbf16>, vector<384x128xbf16>, vector<32x128xf32> -> vector<32x128xf32>
    %c0_3 = arith.constant 0 : index
    %c0_4 = arith.constant 0 : index
    %3 = vector.load %arg3[%c0_3, %c0_4] : memref<1x128xf32, #tpu.memory_space<vmem>>, vector<1x128xf32>
    %4 = vector.broadcast %3 : vector<1x128xf32> to vector<32x128xf32>
    %5 = arith.addf %2, %4 : vector<32x128xf32>
    %cst_5 = arith.constant 0.000000e+00 : f32
    %6 = vector.broadcast %cst_5 : f32 to vector<32x128xf32>
    %7 = arith.maximumf %5, %6 : vector<32x128xf32>
    %c0_6 = arith.constant 0 : index
    %c0_7 = arith.constant 0 : index
    %8 = vector.load %arg4[%c0_6, %c0_7] : memref<32x128xf32, #tpu.memory_space<vmem>>, vector<32x128xf32>
    tpu.vector_store %arg4[%c0_6, %c0_7], %7 {strides = array<i32>} : memref<32x128xf32, #tpu.memory_space<vmem>>, vector<32x128xf32>,
    return
  }
  func.func @transform_0(%arg0: i32) -> (i32, i32) {
    %c0_i32 = arith.constant 0 : i32
    %c0_i32_0 = arith.constant 0 : i32
    return %arg0, %c0_i32 : i32, i32
  }
  func.func @transform_1(%arg0: i32) -> (i32, i32) {
    %c0_i32 = arith.constant 0 : i32
    %c0_i32_0 = arith.constant 0 : i32
    %c0_i32_1 = arith.constant 0 : i32
    return %c0_i32, %c0_i32_0 : i32, i32
  }
  func.func @transform_2(%arg0: i32) -> (i32, i32) {
    %c0_i32 = arith.constant 0 : i32
    %c0_i32_0 = arith.constant 0 : i32
    %c0_i32_1 = arith.constant 0 : i32
    return %c0_i32, %c0_i32_0 : i32, i32
  }
  func.func @transform_3(%arg0: i32) -> (i32, i32) {
    %c0_i32 = arith.constant 0 : i32
    %c0_i32_0 = arith.constant 0 : i32
    return %arg0, %c0_i32 : i32, i32
  }
}

module attributes {stable_mosaic.version = 11 : i64} {
  func.func @_fused_conv_matmul_kernel(%arg0: i32, %arg1: memref<32x128xbf16, #tpu.memory_space<vmem>>, %arg2: memref<128x128xbf16, #tpu.memory_space<vmem>>, %arg3: memref<1x128xf32, #tpu.memory_space<vmem>>, %arg4: memref<32x128xf32, #tpu.memory_space<vmem>>) attributes {dimension_semantics = [#tpu.dimension_semantics<parallel>], iteration_bounds = array<i64: 1>, scalar_prefetch = 0 : i64, scratch_operands = 0 : i64, tpu.core_type = #tpu.core_type<tc>, window_params = [{transform_indices = @transform_0, window_bounds = array<i64: 32, 128>}, {pipeline_mode = #tpu.pipeline_mode<synchronous>, transform_indices = @transform_1, window_bounds = array<i64: 128, 128>}, {pipeline_mode = #tpu.pipeline_mode<synchronous>, transform_indices = @transform_2, window_bounds = array<i64: 1, 128>}, {transform_indices = @transform_3, window_bounds = array<i64: 32, 128>}]} {
    %c0 = arith.constant 0 : index
    %c0_0 = arith.constant 0 : index
    %0 = vector.load %arg1[%c0, %c0_0] : memref<32x128xbf16, #tpu.memory_space<vmem>>, vector<32x128xbf16>
    %c0_1 = arith.constant 0 : index
    %c0_2 = arith.constant 0 : index
    %1 = vector.load %arg2[%c0_1, %c0_2] : memref<128x128xbf16, #tpu.memory_space<vmem>>, vector<128x128xbf16>
    %cst = arith.constant dense<0.000000e+00> : vector<32x128xf32>
    %2 = tpu.matmul %0, %1, %cst {dimension_numbers = #tpu.dot_dimension_numbers<[1], [0], [0], [1], [0, 0, 1, 1], [], []>} : vector<32x128xbf16>, vector<128x128xbf16>, vector<32x128xf32> -> vector<32x128xf32>
    %c0_3 = arith.constant 0 : index
    %c0_4 = arith.constant 0 : index
    %3 = vector.load %arg3[%c0_3, %c0_4] : memref<1x128xf32, #tpu.memory_space<vmem>>, vector<1x128xf32>
    %4 = vector.broadcast %3 : vector<1x128xf32> to vector<32x128xf32>
    %5 = arith.addf %2, %4 : vector<32x128xf32>
    %cst_5 = arith.constant 0.000000e+00 : f32
    %6 = vector.broadcast %cst_5 : f32 to vector<32x128xf32>
    %7 = arith.maximumf %5, %6 : vector<32x128xf32>
    %c0_6 = arith.constant 0 : index
    %c0_7 = arith.constant 0 : index
    %8 = vector.load %arg4[%c0_6, %c0_7] : memref<32x128xf32, #tpu.memory_space<vmem>>, vector<32x128xf32>
    tpu.vector_store %arg4[%c0_6, %c0_7], %7 {strides = array<i32>} : memref<32x128xf32, #tpu.memory_space<vmem>>, vector<32x128xf32>,
    return
  }
  func.func @transform_0(%arg0: i32) -> (i32, i32) {
    %c0_i32 = arith.constant 0 : i32
    %c0_i32_0 = arith.constant 0 : i32
    return %arg0, %c0_i32 : i32, i32
  }
  func.func @transform_1(%arg0: i32) -> (i32, i32) {
    %c0_i32 = arith.constant 0 : i32
    %c0_i32_0 = arith.constant 0 : i32
    %c0_i32_1 = arith.constant 0 : i32
    return %c0_i32, %c0_i32_0 : i32, i32
  }
  func.func @transform_2(%arg0: i32) -> (i32, i32) {
    %c0_i32 = arith.constant 0 : i32
    %c0_i32_0 = arith.constant 0 : i32
    %c0_i32_1 = arith.constant 0 : i32
    return %c0_i32, %c0_i32_0 : i32, i32
  }
  func.func @transform_3(%arg0: i32) -> (i32, i32) {
    %c0_i32 = arith.constant 0 : i32
    %c0_i32_0 = arith.constant 0 : i32
    return %arg0, %c0_i32 : i32, i32
  }
}

module attributes {stable_mosaic.version = 11 : i64} {
  func.func @_fused_conv_matmul_kernel(%arg0: i32, %arg1: memref<128x128xbf16, #tpu.memory_space<vmem>>, %arg2: memref<128x128xbf16, #tpu.memory_space<vmem>>, %arg3: memref<1x128xf32, #tpu.memory_space<vmem>>, %arg4: memref<128x128xf32, #tpu.memory_space<vmem>>) attributes {dimension_semantics = [#tpu.dimension_semantics<parallel>], iteration_bounds = array<i64: 4>, scalar_prefetch = 0 : i64, scratch_operands = 0 : i64, tpu.core_type = #tpu.core_type<tc>, window_params = [{transform_indices = @transform_0, window_bounds = array<i64: 128, 128>}, {pipeline_mode = #tpu.pipeline_mode<synchronous>, transform_indices = @transform_1, window_bounds = array<i64: 128, 128>}, {pipeline_mode = #tpu.pipeline_mode<synchronous>, transform_indices = @transform_2, window_bounds = array<i64: 1, 128>}, {transform_indices = @transform_3, window_bounds = array<i64: 128, 128>}]} {
    %c0 = arith.constant 0 : index
    %c0_0 = arith.constant 0 : index
    %0 = vector.load %arg1[%c0, %c0_0] : memref<128x128xbf16, #tpu.memory_space<vmem>>, vector<128x128xbf16>
    %c0_1 = arith.constant 0 : index
    %c0_2 = arith.constant 0 : index
    %1 = vector.load %arg2[%c0_1, %c0_2] : memref<128x128xbf16, #tpu.memory_space<vmem>>, vector<128x128xbf16>
    %cst = arith.constant dense<0.000000e+00> : vector<128x128xf32>
    %2 = tpu.matmul %0, %1, %cst {dimension_numbers = #tpu.dot_dimension_numbers<[1], [0], [0], [1], [0, 0, 1, 1], [], []>} : vector<128x128xbf16>, vector<128x128xbf16>, vector<128x128xf32> -> vector<128x128xf32>
    %c0_3 = arith.constant 0 : index
    %c0_4 = arith.constant 0 : index
    %3 = vector.load %arg3[%c0_3, %c0_4] : memref<1x128xf32, #tpu.memory_space<vmem>>, vector<1x128xf32>
    %4 = vector.broadcast %3 : vector<1x128xf32> to vector<128x128xf32>
    %5 = arith.addf %2, %4 : vector<128x128xf32>
    %6 = math.tanh %5 : vector<128x128xf32>
    %c0_5 = arith.constant 0 : index
    %c0_6 = arith.constant 0 : index
    %7 = vector.load %arg4[%c0_5, %c0_6] : memref<128x128xf32, #tpu.memory_space<vmem>>, vector<128x128xf32>
    tpu.vector_store %arg4[%c0_5, %c0_6], %6 {strides = array<i32>} : memref<128x128xf32, #tpu.memory_space<vmem>>, vector<128x128xf32>,
    return
  }
  func.func @transform_0(%arg0: i32) -> (i32, i32) {
    %c0_i32 = arith.constant 0 : i32
    %c0_i32_0 = arith.constant 0 : i32
    return %arg0, %c0_i32 : i32, i32
  }
  func.func @transform_1(%arg0: i32) -> (i32, i32) {
    %c0_i32 = arith.constant 0 : i32
    %c0_i32_0 = arith.constant 0 : i32
    %c0_i32_1 = arith.constant 0 : i32
    return %c0_i32, %c0_i32_0 : i32, i32
  }
  func.func @transform_2(%arg0: i32) -> (i32, i32) {
    %c0_i32 = arith.constant 0 : i32
    %c0_i32_0 = arith.constant 0 : i32
    %c0_i32_1 = arith.constant 0 : i32
    return %c0_i32, %c0_i32_0 : i32, i32
  }
  func.func @transform_3(%arg0: i32) -> (i32, i32) {
    %c0_i32 = arith.constant 0 : i32
    %c0_i32_0 = arith.constant 0 : i32
    return %arg0, %c0_i32 : i32, i32
  }
}

</mosaic_0001>

<bundles_post_ra>
// kernel: _lambda_.23
= control target key start
LH: loop header
LB: loop body
LE: loop exit
PB: predicated region body
PF: predicated region fallthrough
CT: control target
= control target key end

     0   :  { %s639_s12 = smov 0   ;;  %s715_s0 = inlined_call_operand.vmem [shape: bf16[512,128], index: 0, kind: input, shape index: {}]   ;;  %s716_s1 = inlined_call_operand.vmem [shape: bf16[128,128], index: 1, kind: input, shape index: {}]   ;;  %s717_s2 = inlined_call_operand.vmem [shape: f32[1,128], index: 2, kind: input, shape index: {}]   ;;  %s718_s3 = inlined_call_operand.vmem [shape: f32[512,128], index: 3, kind: output, shape index: {}]  }
   0x1 LB: > { %s495_s13 = sadd.s32 4294967295, %s617_s12   ;;  %p499_p0 = scmp.ge.s32.totalorder %s617_s12, 1  ;;  %s617_s12 = sphi %s639_s12, %s13_s12  }
   0x2   : > { %p138_p1 = scmp.lt.s32.totalorder %s617_s12, 5 }
   0x4   : > { %p139_p2 = pnand %p499_p0, %p138_p1 }
   0x5   : > { %s500_s16 = sshll.u32 (!%p139_p2), %s495_s13, 4 }
   0x6   : > { %142 = sbr.rel (%p139_p2) target bundleno = 256 (0x100), region = 32  ;;  %p163_p3 = scmp.lt.s32.totalorder (!%p139_p2), %s500_s16, 63 }
   0xb   : > { %v595_v0 = vld [vmem:[%s716_s1 + $0x38] sm:$0xff]   ;;  %v596_v1 = vld [vmem:[%s716_s1 + $0x30] sm:$0xff]   ;;  %s720_s16 = smov (!%p163_p3, %s500_s16), 63  ;;  %v597_v2 = vld [vmem:[%s716_s1 + $0x28] sm:$0xff]  }
   0xc   : > { %539 = vmatprep.subr.bf16.mxu0 %v595_v0  ;;  %571 = vmatprep.subr.bf16.mxu1 %v595_v0  ;;  %s501_s21 = sshll.u32 %s720_s16, 2  ;;  %v598_v3 = vld [vmem:[%s716_s1 + $0x20] sm:$0xff]   ;;  %v599_v6 = vld [vmem:[%s716_s1 + $0x18] sm:$0xff]   ;;  %v600_v7 = vld [vmem:[%s716_s1 + $0x10] sm:$0xff]   ;;  %s503_s10 = sshll.u32 %s720_s16, 3 }
   0xd   : > { %540 = vmatpush3.bf16.msra.mxu0 %v595_v0  ;;  %579 = vmatpush3.bf16.msra.mxu1 %v595_v0  ;;  %s662_s24 = scalar_lea.vmem %s715_s0, %s501_s21  ;;  %v601_v8 = vld [vmem:[%s716_s1 + $0x8] sm:$0xff]   ;;  %v602_v9 = vld [vmem:[%s716_s1] sm:$0xff]   ;;  %s694_s14 = scalar_lea.vmem %s718_s3, %s503_s10 }
   0xe   : > { %541 = vmatprep.subr.bf16.mxu0 %v596_v1  ;;  %572 = vmatprep.subr.bf16.mxu1 %v596_v1  ;;  %v603_v4 = vld [vmem:[%s662_s24] sm:$0xff]   ;;  %v605_v10 = vld [vmem:[%s662_s24 + $0x8] sm:$0xff]   ;;  %v607_v12 = vld [vmem:[%s662_s24 + $0x10] sm:$0xff]  }
   0xf   : > { %v604_v5 = vld [vmem:[%s662_s24 + $0x20] sm:$0xff]   ;;  %555 = vmatprep.mubr.bf16.mxu0 %v603_v4  ;;  %v606_v11 = vld [vmem:[%s662_s24 + $0x28] sm:$0xff]   ;;  %v608_v13 = vld [vmem:[%s662_s24 + $0x30] sm:$0xff]  }
  0x10   : > { %563 = vmatprep.mubr.bf16.mxu1 %v604_v5  ;;  %v609_v14 = vld [vmem:[%s662_s24 + $0x18] sm:$0xff]   ;;  %v504_v16 = vld [vmem:[%s717_s2] ss:$0 sm:$0xff] }
  0x11   : > { %542 = vmatpush3.bf16.msra.mxu0 %v596_v1  ;;  %580 = vmatpush3.bf16.msra.mxu1 %v596_v1  ;;  %v610_v15 = vld [vmem:[%s662_s24 + $0x38] sm:$0xff]  }
  0x12   : > { %543 = vmatprep.subr.bf16.mxu0 %v597_v2  ;;  %573 = vmatprep.subr.bf16.mxu1 %v597_v2 }
  0x15   : > { %544 = vmatpush3.bf16.msra.mxu0 %v597_v2  ;;  %581 = vmatpush3.bf16.msra.mxu1 %v597_v2 }
  0x16   : > { %545 = vmatprep.subr.bf16.mxu0 %v598_v3  ;;  %574 = vmatprep.subr.bf16.mxu1 %v598_v3 }
  0x19   : > { %546 = vmatpush3.bf16.msra.mxu0 %v598_v3  ;;  %582 = vmatpush3.bf16.msra.mxu1 %v598_v3 }
  0x1a   : > { %547 = vmatprep.subr.bf16.mxu0 %v599_v6  ;;  %575 = vmatprep.subr.bf16.mxu1 %v599_v6 }
  0x1d   : > { %548 = vmatpush3.bf16.msra.mxu0 %v599_v6  ;;  %583 = vmatpush3.bf16.msra.mxu1 %v599_v6 }
  0x1e   : > { %549 = vmatprep.subr.bf16.mxu0 %v600_v7  ;;  %576 = vmatprep.subr.bf16.mxu1 %v600_v7 }
  0x21   : > { %550 = vmatpush3.bf16.msra.mxu0 %v600_v7  ;;  %584 = vmatpush3.bf16.msra.mxu1 %v600_v7 }
  0x22   : > { %551 = vmatprep.subr.bf16.mxu0 %v601_v8  ;;  %577 = vmatprep.subr.bf16.mxu1 %v601_v8 }
  0x25   : > { %552 = vmatpush3.bf16.msra.mxu0 %v601_v8  ;;  %585 = vmatpush3.bf16.msra.mxu1 %v601_v8 }
  0x26   : > { %553 = vmatprep.subr.bf16.mxu0 %v602_v9  ;;  %578 = vmatprep.subr.bf16.mxu1 %v602_v9 }
  0x29   : > { %554 = vmatpush3.bf16.msra.mxu0 %v602_v9  ;;  %586 = vmatpush3.bf16.msra.mxu1 %v602_v9 }
  0x2c   : > { %556 = vmatmul.mubr.bf16.vlgmr.msra.gmra.mxu0 %v605_v10  ;;  %564 = vmatmul.mubr.bf16.vlgmr.msra.gmra.mxu1 %v606_v11 }
  0x2d   : > { %559 = vmatprep.mubr.bf16.mxu0 %v607_v12  ;;  %567 = vmatprep.mubr.bf16.mxu1 %v608_v13 }
  0x34   : > { %560 = vmatmul.mubr.bf16.gmra.mxu0 %v609_v14  ;;  %568 = vmatmul.mubr.bf16.gmra.mxu1 %v610_v15 }
  0xec   : > { %v557_v17 = vpop.f32.mrf.mxu0  ;;  %v565_v18 = vpop.f32.mrf.mxu1 }
  0xed   : > { %v353_v19 = vadd.f32 %v557_v17, %v504_v16  ;;  %v385_v20 = vadd.f32 %v565_v18, %v504_v16 }
  0xee   : > { %v344_v21 = vpop.f32.mrf.mxu0  ;;  %v376_v22 = vpop.f32.mrf.mxu1 }
  0xef   : > { %v409_v23 = vmax.f32 %v353_v19, 0.0  ;;  %v417_v24 = vmax.f32 %v385_v20, 0.0  ;;  %v345_v25 = vadd.f32 %v504_v16, %v344_v21  ;;  %v377_v26 = vadd.f32 %v504_v16, %v376_v22 }
  0xf0   : > { %v558_v27 = vpop.f32.mrf.mxu0  ;;  %v566_v28 = vpop.f32.mrf.mxu1 }
  0xf1   : > { %425 = vst [vmem:[%s694_s14 + $0x10] sm:$0xff] %v409_v23  ;;  %433 = vst [vmem:[%s694_s14 + $0x50] sm:$0xff] %v417_v24  ;;  %v407_v29 = vmax.f32 %v345_v25, 0.0  ;;  %v415_v30 = vmax.f32 %v377_v26, 0.0  ;;  %v356_v31 = vadd.f32 %v558_v27, %v504_v16  ;;  %v388_v32 = vadd.f32 %v566_v28, %v504_v16 }
  0xf2   : > { %v347_v33 = vpop.f32.mrf.mxu0  ;;  %v379_v34 = vpop.f32.mrf.mxu1 }
  0xf3   : > { %423 = vst [vmem:[%s694_s14] sm:$0xff] %v407_v29  ;;  %431 = vst [vmem:[%s694_s14 + $0x40] sm:$0xff] %v415_v30  ;;  %v410_v35 = vmax.f32 %v356_v31, 0.0  ;;  %v418_v36 = vmax.f32 %v388_v32, 0.0  ;;  %v348_v37 = vadd.f32 %v504_v16, %v347_v33  ;;  %v380_v38 = vadd.f32 %v504_v16, %v379_v34 }
  0xf4   : > { %v561_v39 = vpop.f32.mrf.mxu0  ;;  %v569_v40 = vpop.f32.mrf.mxu1 }
  0xf5   : > { %426 = vst [vmem:[%s694_s14 + $0x18] sm:$0xff] %v410_v35  ;;  %434 = vst [vmem:[%s694_s14 + $0x58] sm:$0xff] %v418_v36  ;;  %v408_v41 = vmax.f32 %v348_v37, 0.0  ;;  %v416_v42 = vmax.f32 %v380_v38, 0.0  ;;  %v369_v43 = vadd.f32 %v561_v39, %v504_v16  ;;  %v401_v44 = vadd.f32 %v569_v40, %v504_v16 }
  0xf6   : > { %v360_v45 = vpop.f32.mrf.mxu0  ;;  %v392_v46 = vpop.f32.mrf.mxu1 }
  0xf7   : > { %424 = vst [vmem:[%s694_s14 + $0x8] sm:$0xff] %v408_v41  ;;  %432 = vst [vmem:[%s694_s14 + $0x48] sm:$0xff] %v416_v42  ;;  %v413_v47 = vmax.f32 %v369_v43, 0.0  ;;  %v421_v48 = vmax.f32 %v401_v44, 0.0  ;;  %v361_v49 = vadd.f32 %v504_v16, %v360_v45  ;;  %v393_v50 = vadd.f32 %v504_v16, %v392_v46 }
  0xf8   : > { %v562_v51 = vpop.f32.mrf.mxu0  ;;  %v570_v52 = vpop.f32.mrf.mxu1 }
  0xf9   : > { %429 = vst [vmem:[%s694_s14 + $0x30] sm:$0xff] %v413_v47  ;;  %437 = vst [vmem:[%s694_s14 + $0x70] sm:$0xff] %v421_v48  ;;  %v411_v53 = vmax.f32 %v361_v49, 0.0  ;;  %v419_v54 = vmax.f32 %v393_v50, 0.0  ;;  %v372_v55 = vadd.f32 %v562_v51, %v504_v16  ;;  %v404_v56 = vadd.f32 %v570_v52, %v504_v16 }
  0xfa   : > { %v363_v57 = vpop.f32.mrf.mxu0  ;;  %v395_v58 = vpop.f32.mrf.mxu1 }
  0xfb   : > { %427 = vst [vmem:[%s694_s14 + $0x20] sm:$0xff] %v411_v53  ;;  %435 = vst [vmem:[%s694_s14 + $0x60] sm:$0xff] %v419_v54  ;;  %v414_v59 = vmax.f32 %v372_v55, 0.0  ;;  %v422_v60 = vmax.f32 %v404_v56, 0.0  ;;  %v364_v61 = vadd.f32 %v504_v16, %v363_v57  ;;  %v396_v62 = vadd.f32 %v504_v16, %v395_v58 }
  0xfd   : > { %430 = vst [vmem:[%s694_s14 + $0x38] sm:$0xff] %v414_v59  ;;  %438 = vst [vmem:[%s694_s14 + $0x78] sm:$0xff] %v422_v60  ;;  %v412_v63 = vmax.f32 %v364_v61, 0.0  ;;  %v420_v0 = vmax.f32 %v396_v62, 0.0 }
  0xff   : > { %428 = vst [vmem:[%s694_s14 + $0x28] sm:$0xff] %v412_v63  ;;  %436 = vst [vmem:[%s694_s14 + $0x68] sm:$0xff] %v420_v0 }
 0x100 PF: > { %s13_s12 = sadd.s32 1, %s617_s12  }
 0x101   : > { %p10_p4 = scmp.ge.s32.totalorder %s13_s12, 6  }
 0x103   :  { %12 = sbr.rel (!%p10_p4) target bundleno = 1 (0x1), region = 62 }

// kernel: _lambda_.24
= control target key start
LH: loop header
LB: loop body
LE: loop exit
PB: predicated region body
PF: predicated region fallthrough
CT: control target
= control target key end

     0   :  { %s499_s1 = inlined_call_operand.vmem [shape: bf16[128,128], index: 1, kind: input, shape index: {}]   ;;  %s500_s0 = inlined_call_operand.vmem [shape: bf16[128,128], index: 0, kind: input, shape index: {}]   ;;  %s501_s2 = inlined_call_operand.vmem [shape: f32[1,128], index: 2, kind: input, shape index: {}]   ;;  %s502_s3 = inlined_call_operand.vmem [shape: f32[128,128], index: 3, kind: output, shape index: {}]  }
   0x1   :  { %v364_v0 = vld [vmem:[%s499_s1 + $0x38] sm:$0xff]   ;;  %v365_v1 = vld [vmem:[%s499_s1 + $0x30] sm:$0xff]   ;;  %v366_v2 = vld [vmem:[%s499_s1 + $0x28] sm:$0xff]  }
   0x2   :  { %316 = vmatprep.subr.bf16.mxu0 %v364_v0  ;;  %348 = vmatprep.subr.bf16.mxu1 %v364_v0  ;;  %v367_v3 = vld [vmem:[%s499_s1 + $0x20] sm:$0xff]   ;;  %v368_v6 = vld [vmem:[%s499_s1 + $0x18] sm:$0xff]   ;;  %v369_v7 = vld [vmem:[%s499_s1 + $0x10] sm:$0xff]  }
   0x3   :  { %317 = vmatpush3.bf16.msra.mxu0 %v364_v0  ;;  %356 = vmatpush3.bf16.msra.mxu1 %v364_v0  ;;  %v372_v4 = vld [vmem:[%s500_s0] sm:$0xff]   ;;  %v370_v8 = vld [vmem:[%s499_s1 + $0x8] sm:$0xff]   ;;  %v376_v12 = vld [vmem:[%s500_s0 + $0x10] sm:$0xff]  }
   0x4   :  { %318 = vmatprep.subr.bf16.mxu0 %v365_v1  ;;  %349 = vmatprep.subr.bf16.mxu1 %v365_v1  ;;  %v373_v5 = vld [vmem:[%s500_s0 + $0x20] sm:$0xff]   ;;  %v374_v10 = vld [vmem:[%s500_s0 + $0x8] sm:$0xff]   ;;  %v377_v13 = vld [vmem:[%s500_s0 + $0x30] sm:$0xff]  }
   0x5   :  { %332 = vmatprep.mubr.bf16.mxu0 %v372_v4  ;;  %340 = vmatprep.mubr.bf16.mxu1 %v373_v5  ;;  %v371_v9 = vld [vmem:[%s499_s1] sm:$0xff]   ;;  %v375_v11 = vld [vmem:[%s500_s0 + $0x28] sm:$0xff]   ;;  %v378_v14 = vld [vmem:[%s500_s0 + $0x18] sm:$0xff]  }
   0x6   :  { %v379_v15 = vld [vmem:[%s500_s0 + $0x38] sm:$0xff]   ;;  %v283_v16 = vld [vmem:[%s501_s2] ss:$0 sm:$0xff] }
   0x7   :  { %319 = vmatpush3.bf16.msra.mxu0 %v365_v1  ;;  %357 = vmatpush3.bf16.msra.mxu1 %v365_v1 }
   0x8   :  { %320 = vmatprep.subr.bf16.mxu0 %v366_v2  ;;  %350 = vmatprep.subr.bf16.mxu1 %v366_v2 }
   0xb   :  { %321 = vmatpush3.bf16.msra.mxu0 %v366_v2  ;;  %358 = vmatpush3.bf16.msra.mxu1 %v366_v2 }
   0xc   :  { %322 = vmatprep.subr.bf16.mxu0 %v367_v3  ;;  %351 = vmatprep.subr.bf16.mxu1 %v367_v3 }
   0xf   :  { %323 = vmatpush3.bf16.msra.mxu0 %v367_v3  ;;  %359 = vmatpush3.bf16.msra.mxu1 %v367_v3 }
  0x10   :  { %324 = vmatprep.subr.bf16.mxu0 %v368_v6  ;;  %352 = vmatprep.subr.bf16.mxu1 %v368_v6 }
  0x13   :  { %325 = vmatpush3.bf16.msra.mxu0 %v368_v6  ;;  %360 = vmatpush3.bf16.msra.mxu1 %v368_v6 }
  0x14   :  { %326 = vmatprep.subr.bf16.mxu0 %v369_v7  ;;  %353 = vmatprep.subr.bf16.mxu1 %v369_v7 }
  0x17   :  { %327 = vmatpush3.bf16.msra.mxu0 %v369_v7  ;;  %361 = vmatpush3.bf16.msra.mxu1 %v369_v7 }
  0x18   :  { %328 = vmatprep.subr.bf16.mxu0 %v370_v8  ;;  %354 = vmatprep.subr.bf16.mxu1 %v370_v8 }
  0x1b   :  { %329 = vmatpush3.bf16.msra.mxu0 %v370_v8  ;;  %362 = vmatpush3.bf16.msra.mxu1 %v370_v8 }
  0x1c   :  { %330 = vmatprep.subr.bf16.mxu0 %v371_v9  ;;  %355 = vmatprep.subr.bf16.mxu1 %v371_v9 }
  0x1f   :  { %331 = vmatpush3.bf16.msra.mxu0 %v371_v9  ;;  %363 = vmatpush3.bf16.msra.mxu1 %v371_v9 }
  0x22   :  { %333 = vmatmul.mubr.bf16.vlgmr.msra.gmra.mxu0 %v374_v10  ;;  %341 = vmatmul.mubr.bf16.vlgmr.msra.gmra.mxu1 %v375_v11 }
  0x23   :  { %336 = vmatprep.mubr.bf16.mxu0 %v376_v12  ;;  %344 = vmatprep.mubr.bf16.mxu1 %v377_v13 }
  0x2a   :  { %337 = vmatmul.mubr.bf16.gmra.mxu0 %v378_v14  ;;  %345 = vmatmul.mubr.bf16.gmra.mxu1 %v379_v15 }
  0xe2   :  { %v334_v17 = vpop.f32.mrf.mxu0  ;;  %v342_v18 = vpop.f32.mrf.mxu1 }
  0xe3   :  { %v193_v19 = vadd.f32 %v334_v17, %v283_v16  ;;  %v225_v20 = vadd.f32 %v342_v18, %v283_v16 }
  0xe4   :  { %v184_v21 = vpop.f32.mrf.mxu0  ;;  %v216_v22 = vpop.f32.mrf.mxu1 }
  0xe5   :  { %v249_v23 = vmax.f32 %v193_v19, 0.0  ;;  %v257_v24 = vmax.f32 %v225_v20, 0.0  ;;  %v185_v25 = vadd.f32 %v283_v16, %v184_v21  ;;  %v217_v26 = vadd.f32 %v283_v16, %v216_v22 }
  0xe6   :  { %v335_v27 = vpop.f32.mrf.mxu0  ;;  %v343_v28 = vpop.f32.mrf.mxu1 }
  0xe7   :  { %265 = vst [vmem:[%s502_s3 + $0x10] sm:$0xff] %v249_v23  ;;  %273 = vst [vmem:[%s502_s3 + $0x50] sm:$0xff] %v257_v24  ;;  %v247_v29 = vmax.f32 %v185_v25, 0.0  ;;  %v255_v30 = vmax.f32 %v217_v26, 0.0  ;;  %v196_v31 = vadd.f32 %v335_v27, %v283_v16  ;;  %v228_v32 = vadd.f32 %v343_v28, %v283_v16 }
  0xe8   :  { %v187_v33 = vpop.f32.mrf.mxu0  ;;  %v219_v34 = vpop.f32.mrf.mxu1 }
  0xe9   :  { %263 = vst [vmem:[%s502_s3] sm:$0xff] %v247_v29  ;;  %271 = vst [vmem:[%s502_s3 + $0x40] sm:$0xff] %v255_v30  ;;  %v250_v35 = vmax.f32 %v196_v31, 0.0  ;;  %v258_v36 = vmax.f32 %v228_v32, 0.0  ;;  %v188_v37 = vadd.f32 %v283_v16, %v187_v33  ;;  %v220_v38 = vadd.f32 %v283_v16, %v219_v34 }
  0xea   :  { %v338_v39 = vpop.f32.mrf.mxu0  ;;  %v346_v40 = vpop.f32.mrf.mxu1 }
  0xeb   :  { %266 = vst [vmem:[%s502_s3 + $0x18] sm:$0xff] %v250_v35  ;;  %274 = vst [vmem:[%s502_s3 + $0x58] sm:$0xff] %v258_v36  ;;  %v248_v41 = vmax.f32 %v188_v37, 0.0  ;;  %v256_v42 = vmax.f32 %v220_v38, 0.0  ;;  %v209_v43 = vadd.f32 %v338_v39, %v283_v16  ;;  %v241_v44 = vadd.f32 %v346_v40, %v283_v16 }
  0xec   :  { %v200_v45 = vpop.f32.mrf.mxu0  ;;  %v232_v46 = vpop.f32.mrf.mxu1 }
  0xed   :  { %264 = vst [vmem:[%s502_s3 + $0x8] sm:$0xff] %v248_v41  ;;  %272 = vst [vmem:[%s502_s3 + $0x48] sm:$0xff] %v256_v42  ;;  %v253_v47 = vmax.f32 %v209_v43, 0.0  ;;  %v261_v48 = vmax.f32 %v241_v44, 0.0  ;;  %v201_v49 = vadd.f32 %v283_v16, %v200_v45  ;;  %v233_v50 = vadd.f32 %v283_v16, %v232_v46 }
  0xee   :  { %v339_v51 = vpop.f32.mrf.mxu0  ;;  %v347_v52 = vpop.f32.mrf.mxu1 }
  0xef   :  { %269 = vst [vmem:[%s502_s3 + $0x30] sm:$0xff] %v253_v47  ;;  %277 = vst [vmem:[%s502_s3 + $0x70] sm:$0xff] %v261_v48  ;;  %v251_v53 = vmax.f32 %v201_v49, 0.0  ;;  %v259_v54 = vmax.f32 %v233_v50, 0.0  ;;  %v212_v55 = vadd.f32 %v339_v51, %v283_v16  ;;  %v244_v56 = vadd.f32 %v347_v52, %v283_v16 }
  0xf0   :  { %v203_v57 = vpop.f32.mrf.mxu0  ;;  %v235_v58 = vpop.f32.mrf.mxu1 }
  0xf1   :  { %267 = vst [vmem:[%s502_s3 + $0x20] sm:$0xff] %v251_v53  ;;  %275 = vst [vmem:[%s502_s3 + $0x60] sm:$0xff] %v259_v54  ;;  %v254_v59 = vmax.f32 %v212_v55, 0.0  ;;  %v262_v60 = vmax.f32 %v244_v56, 0.0  ;;  %v204_v61 = vadd.f32 %v283_v16, %v203_v57  ;;  %v236_v62 = vadd.f32 %v283_v16, %v235_v58 }
  0xf3   :  { %270 = vst [vmem:[%s502_s3 + $0x38] sm:$0xff] %v254_v59  ;;  %278 = vst [vmem:[%s502_s3 + $0x78] sm:$0xff] %v262_v60  ;;  %v252_v63 = vmax.f32 %v204_v61, 0.0  ;;  %v260_v0 = vmax.f32 %v236_v62, 0.0 }
  0xf5   :  { %268 = vst [vmem:[%s502_s3 + $0x28] sm:$0xff] %v252_v63  ;;  %276 = vst [vmem:[%s502_s3 + $0x68] sm:$0xff] %v260_v0 }

// kernel: _lambda_.25
= control target key start
LH: loop header
LB: loop body
LE: loop exit
PB: predicated region body
PF: predicated region fallthrough
CT: control target
= control target key end

     0   :  { %s717_s1 = inlined_call_operand.vmem [shape: bf16[256,128], index: 1, kind: input, shape index: {}]   ;;  %s718_s0 = inlined_call_operand.vmem [shape: bf16[128,256], index: 0, kind: input, shape index: {}]   ;;  %s719_s2 = inlined_call_operand.vmem [shape: f32[1,128], index: 2, kind: input, shape index: {}]   ;;  %s720_s3 = inlined_call_operand.vmem [shape: f32[128,128], index: 3, kind: output, shape index: {}]  }
   0x1   :  { %v492_v0 = vld [vmem:[%s717_s1 + $0x78] sm:$0xff]   ;;  %v494_v2 = vld [vmem:[%s717_s1 + $0x70] sm:$0xff]   ;;  %v496_v4 = vld [vmem:[%s717_s1 + $0x68] sm:$0xff]  }
   0x2   :  { %v493_v1 = vld [vmem:[%s717_s1 + $0x38] sm:$0xff]   ;;  %412 = vmatprep.subr.bf16.mxu0 %v492_v0  ;;  %476 = vmatprep.subr.bf16.mxu1 %v492_v0  ;;  %v495_v3 = vld [vmem:[%s717_s1 + $0x30] sm:$0xff]   ;;  %v497_v5 = vld [vmem:[%s717_s1 + $0x28] sm:$0xff]  }
   0x3   :  { %413 = vmatpush3.bf16.msra.mxu0 %v493_v1  ;;  %484 = vmatpush3.bf16.msra.mxu1 %v493_v1  ;;  %v498_v6 = vld [vmem:[%s717_s1 + $0x60] sm:$0xff]   ;;  %v500_v8 = vld [vmem:[%s717_s1 + $0x58] sm:$0xff]   ;;  %v502_v10 = vld [vmem:[%s717_s1 + $0x50] sm:$0xff]  }
   0x4   :  { %414 = vmatprep.subr.bf16.mxu0 %v494_v2  ;;  %477 = vmatprep.subr.bf16.mxu1 %v494_v2  ;;  %v499_v7 = vld [vmem:[%s717_s1 + $0x20] sm:$0xff]   ;;  %v501_v9 = vld [vmem:[%s717_s1 + $0x18] sm:$0xff]   ;;  %v503_v13 = vld [vmem:[%s717_s1 + $0x10] sm:$0xff]  }
   0x5   :  { %v510_v11 = vld [vmem:[%s718_s0 + $0x4] ss:$8 sps:$4 sm:$0xff]   ;;  %v508_v18 = vld [vmem:[%s718_s0] ss:$8 sps:$4 sm:$0xff]   ;;  %v514_v20 = vld [vmem:[%s718_s0 + $0x14] ss:$8 sps:$4 sm:$0xff]  }
   0x6   :  { %v513_v12 = vld [vmem:[%s718_s0 + $0x44] ss:$8 sps:$4 sm:$0xff]   ;;  %278 = vmatprep.mubr.bf16.mxu0 %v510_v11  ;;  %v511_v19 = vld [vmem:[%s718_s0 + $0x40] ss:$8 sps:$4 sm:$0xff]   ;;  %v516_v21 = vld [vmem:[%s718_s0 + $0x54] ss:$8 sps:$4 sm:$0xff]  }
   0x7   :  { %415 = vmatpush3.bf16.msra.mxu0 %v495_v3  ;;  %485 = vmatpush3.bf16.msra.mxu1 %v495_v3  ;;  %v504_v14 = vld [vmem:[%s717_s1 + $0x48] sm:$0xff]   ;;  %v506_v16 = vld [vmem:[%s717_s1 + $0x40] sm:$0xff]   ;;  %v518_v22 = vld [vmem:[%s718_s0 + $0x10] ss:$8 sps:$4 sm:$0xff]  }
   0x8   :  { %416 = vmatprep.subr.bf16.mxu0 %v496_v4  ;;  %478 = vmatprep.subr.bf16.mxu1 %v496_v4  ;;  %v505_v15 = vld [vmem:[%s717_s1 + $0x8] sm:$0xff]   ;;  %v507_v17 = vld [vmem:[%s717_s1] sm:$0xff]   ;;  %v519_v23 = vld [vmem:[%s718_s0 + $0x50] ss:$8 sps:$4 sm:$0xff]  }
   0x9   :  { %310 = vmatprep.mubr.bf16.mxu1 %v513_v12  ;;  %v520_v24 = vld [vmem:[%s718_s0 + $0x24] ss:$8 sps:$4 sm:$0xff]   ;;  %v524_v26 = vld [vmem:[%s718_s0 + $0x20] ss:$8 sps:$4 sm:$0xff]   ;;  %v526_v28 = vld [vmem:[%s718_s0 + $0x34] ss:$8 sps:$4 sm:$0xff]  }
   0xa   :  { %v522_v25 = vld [vmem:[%s718_s0 + $0x64] ss:$8 sps:$4 sm:$0xff]   ;;  %v525_v27 = vld [vmem:[%s718_s0 + $0x60] ss:$8 sps:$4 sm:$0xff]   ;;  %v528_v29 = vld [vmem:[%s718_s0 + $0x74] ss:$8 sps:$4 sm:$0xff]  }
   0xb   :  { %417 = vmatpush3.bf16.msra.mxu0 %v497_v5  ;;  %486 = vmatpush3.bf16.msra.mxu1 %v497_v5  ;;  %v530_v30 = vld [vmem:[%s718_s0 + $0x30] ss:$8 sps:$4 sm:$0xff]   ;;  %v651_v34 = vld [vmem:[%s719_s2] ss:$0 sm:$0xff] }
   0xc   :  { %418 = vmatprep.subr.bf16.mxu0 %v498_v6  ;;  %479 = vmatprep.subr.bf16.mxu1 %v498_v6  ;;  %v531_v31 = vld [vmem:[%s718_s0 + $0x70] ss:$8 sps:$4 sm:$0xff]  }
   0xf   :  { %419 = vmatpush3.bf16.msra.mxu0 %v499_v7  ;;  %487 = vmatpush3.bf16.msra.mxu1 %v499_v7 }
  0x10   :  { %420 = vmatprep.subr.bf16.mxu0 %v500_v8  ;;  %480 = vmatprep.subr.bf16.mxu1 %v500_v8 }
  0x13   :  { %421 = vmatpush3.bf16.msra.mxu0 %v501_v9  ;;  %488 = vmatpush3.bf16.msra.mxu1 %v501_v9 }
  0x14   :  { %422 = vmatprep.subr.bf16.mxu0 %v502_v10  ;;  %481 = vmatprep.subr.bf16.mxu1 %v502_v10 }
  0x17   :  { %423 = vmatpush3.bf16.msra.mxu0 %v503_v13  ;;  %489 = vmatpush3.bf16.msra.mxu1 %v503_v13 }
  0x18   :  { %424 = vmatprep.subr.bf16.mxu0 %v504_v14  ;;  %482 = vmatprep.subr.bf16.mxu1 %v504_v14 }
  0x1b   :  { %425 = vmatpush3.bf16.msra.mxu0 %v505_v15  ;;  %490 = vmatpush3.bf16.msra.mxu1 %v505_v15 }
  0x1c   :  { %426 = vmatprep.subr.bf16.mxu0 %v506_v16  ;;  %483 = vmatprep.subr.bf16.mxu1 %v506_v16 }
  0x1f   :  { %427 = vmatpush3.bf16.msra.mxu0 %v507_v17  ;;  %491 = vmatpush3.bf16.msra.mxu1 %v507_v17 }
  0x22   :  { %279 = vmatmul.mubr.bf16.vlgmr.msra.gmra.mxu0 %v508_v18  ;;  %311 = vmatmul.mubr.bf16.vlgmr.msra.gmra.mxu1 %v511_v19 }
  0x23   :  { %286 = vmatprep.mubr.bf16.mxu0 %v514_v20  ;;  %318 = vmatprep.mubr.bf16.mxu1 %v516_v21 }
  0x2a   :  { %287 = vmatmul.mubr.bf16.gmra.mxu0 %v518_v22  ;;  %319 = vmatmul.mubr.bf16.gmra.mxu1 %v519_v23 }
  0x2b   :  { %294 = vmatprep.mubr.bf16.mxu0 %v520_v24  ;;  %326 = vmatprep.mubr.bf16.mxu1 %v522_v25 }
  0x32   :  { %295 = vmatmul.mubr.bf16.gmra.mxu0 %v524_v26  ;;  %327 = vmatmul.mubr.bf16.gmra.mxu1 %v525_v27 }
  0x33   :  { %302 = vmatprep.mubr.bf16.mxu0 %v526_v28  ;;  %334 = vmatprep.mubr.bf16.mxu1 %v528_v29 }
  0x3a   :  { %303 = vmatmul.mubr.bf16.gmra.mxu0 %v530_v30  ;;  %335 = vmatmul.mubr.bf16.gmra.mxu1 %v531_v31 }
  0xe2   :  { %v428_v32 = vpop.f32.mrf.mxu0  ;;  %v452_v33 = vpop.f32.mrf.mxu1 }
  0xe4   :  { %v429_v35 = vpop.f32.mrf.mxu0  ;;  %v453_v36 = vpop.f32.mrf.mxu1 }
  0xe5   :  { %v430_v37 = vadd.f32 %v429_v35, %v428_v32  ;;  %v454_v38 = vadd.f32 %v453_v36, %v452_v33 }
  0xe6   :  { %v431_v39 = vpop.f32.mrf.mxu0  ;;  %v455_v40 = vpop.f32.mrf.mxu1 }
  0xe7   :  { %v281_v41 = vadd.f32 %v430_v37, %v651_v34  ;;  %v313_v42 = vadd.f32 %v454_v38, %v651_v34 }
  0xe8   :  { %v432_v43 = vpop.f32.mrf.mxu0  ;;  %v456_v44 = vpop.f32.mrf.mxu1 }
  0xe9   :  { %v343_v45 = vmax.f32 %v281_v41, 0.0  ;;  %v351_v46 = vmax.f32 %v313_v42, 0.0  ;;  %v433_v47 = vadd.f32 %v432_v43, %v431_v39  ;;  %v457_v48 = vadd.f32 %v456_v44, %v455_v40 }
  0xea   :  { %v434_v49 = vpop.f32.mrf.mxu0  ;;  %v458_v50 = vpop.f32.mrf.mxu1 }
  0xeb   :  { %359 = vst [vmem:[%s720_s3] sm:$0xff] %v343_v45  ;;  %367 = vst [vmem:[%s720_s3 + $0x40] sm:$0xff] %v351_v46  ;;  %v284_v51 = vadd.f32 %v433_v47, %v651_v34  ;;  %v316_v52 = vadd.f32 %v457_v48, %v651_v34 }
  0xec   :  { %v435_v53 = vpop.f32.mrf.mxu0  ;;  %v459_v54 = vpop.f32.mrf.mxu1 }
  0xed   :  { %v344_v55 = vmax.f32 %v284_v51, 0.0  ;;  %v352_v56 = vmax.f32 %v316_v52, 0.0  ;;  %v436_v57 = vadd.f32 %v435_v53, %v434_v49  ;;  %v460_v58 = vadd.f32 %v459_v54, %v458_v50 }
  0xee   :  { %v437_v59 = vpop.f32.mrf.mxu0  ;;  %v461_v60 = vpop.f32.mrf.mxu1 }
  0xef   :  { %360 = vst [vmem:[%s720_s3 + $0x8] sm:$0xff] %v344_v55  ;;  %368 = vst [vmem:[%s720_s3 + $0x48] sm:$0xff] %v352_v56  ;;  %v289_v61 = vadd.f32 %v436_v57, %v651_v34  ;;  %v321_v62 = vadd.f32 %v460_v58, %v651_v34 }
  0xf0   :  { %v438_v63 = vpop.f32.mrf.mxu0  ;;  %v462_v0 = vpop.f32.mrf.mxu1 }
  0xf1   :  { %v345_v1 = vmax.f32 %v289_v61, 0.0  ;;  %v353_v2 = vmax.f32 %v321_v62, 0.0  ;;  %v439_v3 = vadd.f32 %v438_v63, %v437_v59  ;;  %v463_v4 = vadd.f32 %v462_v0, %v461_v60 }
  0xf2   :  { %v440_v5 = vpop.f32.mrf.mxu0  ;;  %v464_v6 = vpop.f32.mrf.mxu1 }
  0xf3   :  { %361 = vst [vmem:[%s720_s3 + $0x10] sm:$0xff] %v345_v1  ;;  %369 = vst [vmem:[%s720_s3 + $0x50] sm:$0xff] %v353_v2  ;;  %v292_v7 = vadd.f32 %v439_v3, %v651_v34  ;;  %v324_v8 = vadd.f32 %v463_v4, %v651_v34 }
  0xf4   :  { %v441_v9 = vpop.f32.mrf.mxu0  ;;  %v465_v10 = vpop.f32.mrf.mxu1 }
  0xf5   :  { %v346_v11 = vmax.f32 %v292_v7, 0.0  ;;  %v354_v12 = vmax.f32 %v324_v8, 0.0  ;;  %v442_v13 = vadd.f32 %v441_v9, %v440_v5  ;;  %v466_v14 = vadd.f32 %v465_v10, %v464_v6 }
  0xf6   :  { %v443_v15 = vpop.f32.mrf.mxu0  ;;  %v467_v16 = vpop.f32.mrf.mxu1 }
  0xf7   :  { %362 = vst [vmem:[%s720_s3 + $0x18] sm:$0xff] %v346_v11  ;;  %370 = vst [vmem:[%s720_s3 + $0x58] sm:$0xff] %v354_v12  ;;  %v297_v17 = vadd.f32 %v442_v13, %v651_v34  ;;  %v329_v18 = vadd.f32 %v466_v14, %v651_v34 }
  0xf8   :  { %v444_v19 = vpop.f32.mrf.mxu0  ;;  %v468_v20 = vpop.f32.mrf.mxu1 }
  0xf9   :  { %v347_v21 = vmax.f32 %v297_v17, 0.0  ;;  %v355_v22 = vmax.f32 %v329_v18, 0.0  ;;  %v445_v23 = vadd.f32 %v444_v19, %v443_v15  ;;  %v469_v24 = vadd.f32 %v468_v20, %v467_v16 }
  0xfa   :  { %v446_v25 = vpop.f32.mrf.mxu0  ;;  %v470_v26 = vpop.f32.mrf.mxu1 }
  0xfb   :  { %363 = vst [vmem:[%s720_s3 + $0x20] sm:$0xff] %v347_v21  ;;  %371 = vst [vmem:[%s720_s3 + $0x60] sm:$0xff] %v355_v22  ;;  %v300_v27 = vadd.f32 %v445_v23, %v651_v34  ;;  %v332_v28 = vadd.f32 %v469_v24, %v651_v34 }
  0xfc   :  { %v447_v29 = vpop.f32.mrf.mxu0  ;;  %v471_v30 = vpop.f32.mrf.mxu1 }
  0xfd   :  { %v348_v31 = vmax.f32 %v300_v27, 0.0  ;;  %v356_v32 = vmax.f32 %v332_v28, 0.0  ;;  %v448_v33 = vadd.f32 %v447_v29, %v446_v25  ;;  %v472_v35 = vadd.f32 %v471_v30, %v470_v26 }
  0xfe   :  { %v449_v36 = vpop.f32.mrf.mxu0  ;;  %v473_v37 = vpop.f32.mrf.mxu1 }
  0xff   :  { %364 = vst [vmem:[%s720_s3 + $0x28] sm:$0xff] %v348_v31  ;;  %372 = vst [vmem:[%s720_s3 + $0x68] sm:$0xff] %v356_v32  ;;  %v305_v38 = vadd.f32 %v448_v33, %v651_v34  ;;  %v337_v39 = vadd.f32 %v472_v35, %v651_v34 }
 0x100   :  { %v450_v40 = vpop.f32.mrf.mxu0  ;;  %v474_v41 = vpop.f32.mrf.mxu1 }
 0x101   :  { %v349_v42 = vmax.f32 %v305_v38, 0.0  ;;  %v357_v43 = vmax.f32 %v337_v39, 0.0  ;;  %v451_v44 = vadd.f32 %v450_v40, %v449_v36  ;;  %v475_v45 = vadd.f32 %v474_v41, %v473_v37 }
 0x103   :  { %365 = vst [vmem:[%s720_s3 + $0x30] sm:$0xff] %v349_v42  ;;  %373 = vst [vmem:[%s720_s3 + $0x70] sm:$0xff] %v357_v43  ;;  %v308_v46 = vadd.f32 %v451_v44, %v651_v34  ;;  %v340_v47 = vadd.f32 %v475_v45, %v651_v34 }
 0x105   :  { %v350_v48 = vmax.f32 %v308_v46, 0.0  ;;  %v358_v49 = vmax.f32 %v340_v47, 0.0 }
 0x107   :  { %366 = vst [vmem:[%s720_s3 + $0x38] sm:$0xff] %v350_v48  ;;  %374 = vst [vmem:[%s720_s3 + $0x78] sm:$0xff] %v358_v49 }

// kernel: _lambda_.26
= control target key start
LH: loop header
LB: loop body
LE: loop exit
PB: predicated region body
PF: predicated region fallthrough
CT: control target
= control target key end

     0   :  { %s417_s1 = inlined_call_operand.vmem [shape: bf16[256,128], index: 1, kind: input, shape index: {}]   ;;  %s418_s0 = inlined_call_operand.vmem [shape: bf16[32,256], index: 0, kind: input, shape index: {}]   ;;  %s419_s2 = inlined_call_operand.vmem [shape: f32[1,128], index: 2, kind: input, shape index: {}]   ;;  %s420_s3 = inlined_call_operand.vmem [shape: f32[32,128], index: 3, kind: output, shape index: {}]  }
   0x1   :  { %v300_v0 = vld [vmem:[%s417_s1 + $0x78] sm:$0xff]   ;;  %v302_v2 = vld [vmem:[%s417_s1 + $0x70] sm:$0xff]   ;;  %v304_v4 = vld [vmem:[%s417_s1 + $0x68] sm:$0xff]  }
   0x2   :  { %v301_v1 = vld [vmem:[%s417_s1 + $0x38] sm:$0xff]   ;;  %256 = vmatprep.subr.bf16.mxu0 %v300_v0  ;;  %284 = vmatprep.subr.bf16.mxu1 %v300_v0  ;;  %v303_v3 = vld [vmem:[%s417_s1 + $0x30] sm:$0xff]   ;;  %v305_v5 = vld [vmem:[%s417_s1 + $0x28] sm:$0xff]  }
   0x3   :  { %257 = vmatpush3.bf16.msra.mxu0 %v301_v1  ;;  %292 = vmatpush3.bf16.msra.mxu1 %v301_v1  ;;  %v306_v6 = vld [vmem:[%s417_s1 + $0x60] sm:$0xff]   ;;  %v308_v8 = vld [vmem:[%s417_s1 + $0x58] sm:$0xff]   ;;  %v310_v10 = vld [vmem:[%s417_s1 + $0x50] sm:$0xff]  }
   0x4   :  { %258 = vmatprep.subr.bf16.mxu0 %v302_v2  ;;  %285 = vmatprep.subr.bf16.mxu1 %v302_v2  ;;  %v307_v7 = vld [vmem:[%s417_s1 + $0x20] sm:$0xff]   ;;  %v309_v9 = vld [vmem:[%s417_s1 + $0x18] sm:$0xff]   ;;  %v311_v13 = vld [vmem:[%s417_s1 + $0x10] sm:$0xff]  }
   0x5   :  { %v318_v11 = vld [vmem:[%s418_s0 + $0x4] ss:$8 sps:$4 sm:$0xff]   ;;  %v321_v12 = vld [vmem:[%s418_s0 + $0x14] ss:$8 sps:$4 sm:$0xff]   ;;  %v316_v18 = vld [vmem:[%s418_s0] ss:$8 sps:$4 sm:$0xff]  }
   0x6   :  { %v312_v14 = vld [vmem:[%s417_s1 + $0x48] sm:$0xff]   ;;  %206 = vmatprep.mubr.bf16.mxu0 %v318_v11  ;;  %214 = vmatprep.mubr.bf16.mxu1 %v321_v12  ;;  %v314_v16 = vld [vmem:[%s417_s1 + $0x40] sm:$0xff]   ;;  %v319_v19 = vld [vmem:[%s418_s0 + $0x10] ss:$8 sps:$4 sm:$0xff]  }
   0x7   :  { %259 = vmatpush3.bf16.msra.mxu0 %v303_v3  ;;  %293 = vmatpush3.bf16.msra.mxu1 %v303_v3  ;;  %v313_v15 = vld [vmem:[%s417_s1 + $0x8] sm:$0xff]   ;;  %v315_v17 = vld [vmem:[%s417_s1] sm:$0xff]  }
   0x8   :  { %260 = vmatprep.subr.bf16.mxu0 %v304_v4  ;;  %286 = vmatprep.subr.bf16.mxu1 %v304_v4  ;;  %v235_v22 = vld [vmem:[%s419_s2] ss:$0 sm:$0xff] }
   0xb   :  { %261 = vmatpush3.bf16.msra.mxu0 %v305_v5  ;;  %294 = vmatpush3.bf16.msra.mxu1 %v305_v5 }
   0xc   :  { %262 = vmatprep.subr.bf16.mxu0 %v306_v6  ;;  %287 = vmatprep.subr.bf16.mxu1 %v306_v6 }
   0xf   :  { %263 = vmatpush3.bf16.msra.mxu0 %v307_v7  ;;  %295 = vmatpush3.bf16.msra.mxu1 %v307_v7 }
  0x10   :  { %264 = vmatprep.subr.bf16.mxu0 %v308_v8  ;;  %288 = vmatprep.subr.bf16.mxu1 %v308_v8 }
  0x13   :  { %265 = vmatpush3.bf16.msra.mxu0 %v309_v9  ;;  %296 = vmatpush3.bf16.msra.mxu1 %v309_v9 }
  0x14   :  { %266 = vmatprep.subr.bf16.mxu0 %v310_v10  ;;  %289 = vmatprep.subr.bf16.mxu1 %v310_v10 }
  0x17   :  { %267 = vmatpush3.bf16.msra.mxu0 %v311_v13  ;;  %297 = vmatpush3.bf16.msra.mxu1 %v311_v13 }
  0x18   :  { %268 = vmatprep.subr.bf16.mxu0 %v312_v14  ;;  %290 = vmatprep.subr.bf16.mxu1 %v312_v14 }
  0x1b   :  { %269 = vmatpush3.bf16.msra.mxu0 %v313_v15  ;;  %298 = vmatpush3.bf16.msra.mxu1 %v313_v15 }
  0x1c   :  { %270 = vmatprep.subr.bf16.mxu0 %v314_v16  ;;  %291 = vmatprep.subr.bf16.mxu1 %v314_v16 }
  0x1f   :  { %271 = vmatpush3.bf16.msra.mxu0 %v315_v17  ;;  %299 = vmatpush3.bf16.msra.mxu1 %v315_v17 }
  0x22   :  { %207 = vmatmul.mubr.bf16.vlgmr.msra.gmra.mxu0 %v316_v18  ;;  %215 = vmatmul.mubr.bf16.vlgmr.msra.gmra.mxu1 %v319_v19 }
  0xe2   :  { %v272_v20 = vpop.f32.mrf.mxu0  ;;  %v278_v21 = vpop.f32.mrf.mxu1 }
  0xe4   :  { %v273_v23 = vpop.f32.mrf.mxu0  ;;  %v279_v24 = vpop.f32.mrf.mxu1 }
  0xe5   :  { %v274_v25 = vadd.f32 %v273_v23, %v272_v20  ;;  %v280_v26 = vadd.f32 %v279_v24, %v278_v21 }
  0xe6   :  { %v275_v27 = vpop.f32.mrf.mxu0  ;;  %v281_v28 = vpop.f32.mrf.mxu1 }
  0xe7   :  { %v209_v29 = vadd.f32 %v274_v25, %v235_v22  ;;  %v217_v30 = vadd.f32 %v280_v26, %v235_v22 }
  0xe8   :  { %v276_v31 = vpop.f32.mrf.mxu0  ;;  %v282_v32 = vpop.f32.mrf.mxu1 }
  0xe9   :  { %v223_v33 = vmax.f32 %v209_v29, 0.0  ;;  %v225_v34 = vmax.f32 %v217_v30, 0.0  ;;  %v277_v35 = vadd.f32 %v276_v31, %v275_v27  ;;  %v283_v36 = vadd.f32 %v282_v32, %v281_v28 }
  0xeb   :  { %227 = vst [vmem:[%s420_s3] sm:$0xff] %v223_v33  ;;  %229 = vst [vmem:[%s420_s3 + $0x10] sm:$0xff] %v225_v34  ;;  %v212_v37 = vadd.f32 %v277_v35, %v235_v22  ;;  %v220_v38 = vadd.f32 %v283_v36, %v235_v22 }
  0xed   :  { %v224_v39 = vmax.f32 %v212_v37, 0.0  ;;  %v226_v40 = vmax.f32 %v220_v38, 0.0 }
  0xef   :  { %228 = vst [vmem:[%s420_s3 + $0x8] sm:$0xff] %v224_v39  ;;  %230 = vst [vmem:[%s420_s3 + $0x18] sm:$0xff] %v226_v40 }

// kernel: _lambda_.27
= control target key start
LH: loop header
LB: loop body
LE: loop exit
PB: predicated region body
PF: predicated region fallthrough
CT: control target
= control target key end

     0   :  { %s610_s1 = inlined_call_operand.vmem [shape: bf16[384,128], index: 1, kind: input, shape index: {}]   ;;  %s611_s0 = inlined_call_operand.vmem [shape: bf16[32,384], index: 0, kind: input, shape index: {}]   ;;  %s612_s2 = inlined_call_operand.vmem [shape: f32[1,128], index: 2, kind: input, shape index: {}]   ;;  %s613_s3 = inlined_call_operand.vmem [shape: f32[32,128], index: 3, kind: output, shape index: {}]  }
   0x1   :  { %v453_v0 = vld [vmem:[%s610_s1 + $0x78] sm:$0xff]   ;;  %v455_v2 = vld [vmem:[%s610_s1 + $0x70] sm:$0xff]   ;;  %v458_v5 = vld [vmem:[%s610_s1 + $0x68] sm:$0xff]  }
   0x2   :  { %v454_v1 = vld [vmem:[%s610_s1 + $0x38] sm:$0xff]   ;;  %395 = vmatprep.subr.bf16.mxu0 %v453_v0  ;;  %v457_v4 = vld [vmem:[%s610_s1 + $0x30] sm:$0xff]   ;;  %v460_v7 = vld [vmem:[%s610_s1 + $0x28] sm:$0xff]  }
   0x3   :  { %396 = vmatpush3.bf16.msra.mxu0 %v454_v1  ;;  %v456_v3 = vld [vmem:[%s610_s1 + $0xb8] sm:$0xff]   ;;  %v459_v6 = vld [vmem:[%s610_s1 + $0xb0] sm:$0xff]   ;;  %v461_v8 = vld [vmem:[%s610_s1 + $0x60] sm:$0xff]  }
   0x4   :  { %397 = vmatprep.subr.bf16.mxu0 %v455_v2  ;;  %433 = vmatprep.subr.bf16.mxu1 %v456_v3  ;;  %v462_v9 = vld [vmem:[%s610_s1 + $0xa8] sm:$0xff]   ;;  %v463_v10 = vld [vmem:[%s610_s1 + $0x20] sm:$0xff]   ;;  %v464_v11 = vld [vmem:[%s610_s1 + $0x58] sm:$0xff]  }
   0x5   :  { %434 = vmatpush3.bf16.msra.mxu1 %v456_v3  ;;  %v465_v12 = vld [vmem:[%s610_s1 + $0xa0] sm:$0xff]   ;;  %v466_v13 = vld [vmem:[%s610_s1 + $0x18] sm:$0xff]   ;;  %v467_v15 = vld [vmem:[%s610_s1 + $0x50] sm:$0xff]  }
   0x6   :  { %435 = vmatprep.subr.bf16.mxu1 %v459_v6  ;;  %v468_v14 = vld [vmem:[%s610_s1 + $0x98] sm:$0xff]   ;;  %v469_v16 = vld [vmem:[%s610_s1 + $0x10] sm:$0xff]   ;;  %v470_v18 = vld [vmem:[%s610_s1 + $0x48] sm:$0xff]  }
   0x7   :  { %398 = vmatpush3.bf16.msra.mxu0 %v457_v4  ;;  %v471_v17 = vld [vmem:[%s610_s1 + $0x90] sm:$0xff]   ;;  %v472_v19 = vld [vmem:[%s610_s1 + $0x8] sm:$0xff]   ;;  %v473_v20 = vld [vmem:[%s610_s1 + $0x40] sm:$0xff]  }
   0x8   :  { %399 = vmatprep.subr.bf16.mxu0 %v458_v5  ;;  %v474_v21 = vld [vmem:[%s610_s1 + $0x88] sm:$0xff]   ;;  %v478_v22 = vld [vmem:[%s611_s0 + $0x4] ss:$12 sps:$4 sm:$0xff]   ;;  %v364_v32 = vld [vmem:[%s612_s2] ss:$0 sm:$0xff] }
   0x9   :  { %436 = vmatpush3.bf16.msra.mxu1 %v459_v6  ;;  %v475_v23 = vld [vmem:[%s610_s1] sm:$0xff]   ;;  %286 = vmatprep.mubr.bf16.mxu0 %v478_v22  ;;  %v480_v24 = vld [vmem:[%s611_s0 + $0x8] ss:$12 sps:$4 sm:$0xff]  }
   0xa   :  { %437 = vmatprep.subr.bf16.mxu1 %v462_v9  ;;  %v479_v25 = vld [vmem:[%s610_s1 + $0x80] sm:$0xff]   ;;  %449 = vmatprep.mubr.bf16.mxu1 %v480_v24  ;;  %v482_v27 = vld [vmem:[%s611_s0 + $0x1c] ss:$12 sps:$4 sm:$0xff]  }
   0xb   :  { %400 = vmatpush3.bf16.msra.mxu0 %v460_v7  ;;  %v476_v26 = vld [vmem:[%s611_s0] ss:$12 sps:$4 sm:$0xff]   ;;  %v484_v29 = vld [vmem:[%s611_s0 + $0x18] ss:$12 sps:$4 sm:$0xff]  }
   0xc   :  { %401 = vmatprep.subr.bf16.mxu0 %v461_v8  ;;  %v481_v28 = vld [vmem:[%s611_s0 + $0x20] ss:$12 sps:$4 sm:$0xff]  }
   0xd   :  { %438 = vmatpush3.bf16.msra.mxu1 %v462_v9 }
   0xe   :  { %439 = vmatprep.subr.bf16.mxu1 %v465_v12 }
   0xf   :  { %402 = vmatpush3.bf16.msra.mxu0 %v463_v10 }
  0x10   :  { %403 = vmatprep.subr.bf16.mxu0 %v464_v11 }
  0x11   :  { %440 = vmatpush3.bf16.msra.mxu1 %v465_v12 }
  0x12   :  { %441 = vmatprep.subr.bf16.mxu1 %v468_v14 }
  0x13   :  { %404 = vmatpush3.bf16.msra.mxu0 %v466_v13 }
  0x14   :  { %405 = vmatprep.subr.bf16.mxu0 %v467_v15 }
  0x15   :  { %442 = vmatpush3.bf16.msra.mxu1 %v468_v14 }
  0x16   :  { %443 = vmatprep.subr.bf16.mxu1 %v471_v17 }
  0x17   :  { %406 = vmatpush3.bf16.msra.mxu0 %v469_v16 }
  0x18   :  { %407 = vmatprep.subr.bf16.mxu0 %v470_v18 }
  0x19   :  { %444 = vmatpush3.bf16.msra.mxu1 %v471_v17 }
  0x1a   :  { %445 = vmatprep.subr.bf16.mxu1 %v474_v21 }
  0x1b   :  { %408 = vmatpush3.bf16.msra.mxu0 %v472_v19 }
  0x1c   :  { %409 = vmatprep.subr.bf16.mxu0 %v473_v20 }
  0x1d   :  { %446 = vmatpush3.bf16.msra.mxu1 %v474_v21 }
  0x1e   :  { %447 = vmatprep.subr.bf16.mxu1 %v479_v25 }
  0x1f   :  { %410 = vmatpush3.bf16.msra.mxu0 %v475_v23 }
  0x21   :  { %448 = vmatpush3.bf16.msra.mxu1 %v479_v25 }
  0x22   :  { %287 = vmatmul.mubr.bf16.vlgmr.msra.gmra.mxu0 %v476_v26 }
  0x23   :  { %294 = vmatprep.mubr.bf16.mxu0 %v482_v27 }
  0x24   :  { %450 = vmatmul.mubr.bf16.vlgmr.msra.gmra.mxu1 %v481_v28 }
  0x2a   :  { %295 = vmatmul.mubr.bf16.gmra.mxu0 %v484_v29 }
  0xe2   :  { %v411_v30 = vpop.f32.mrf.mxu0 }
  0xe4   :  { %v412_v31 = vpop.f32.mrf.mxu0  ;;  %v451_v34 = vpop.f32.mrf.mxu1 }
  0xe5   :  { %v413_v33 = vadd.f32 %v412_v31, %v411_v30 }
  0xe6   :  { %v414_v35 = vpop.f32.mrf.mxu0  ;;  %v337_v37 = vpop.f32.mrf.mxu1 }
  0xe7   :  { %v289_v36 = vadd.f32 %v413_v33, %v364_v32 }
  0xe8   :  { %v415_v38 = vpop.f32.mrf.mxu0  ;;  %v452_v41 = vpop.f32.mrf.mxu1 }
  0xe9   :  { %v416_v39 = vadd.f32 %v415_v38, %v414_v35  ;;  %v338_v40 = vadd.f32 %v337_v37, %v289_v36 }
  0xea   :  { %v417_v42 = vpop.f32.mrf.mxu0  ;;  %v340_v45 = vpop.f32.mrf.mxu1 }
  0xeb   :  { %v352_v43 = vmax.f32 %v338_v40, 0.0  ;;  %v292_v44 = vadd.f32 %v416_v39, %v364_v32 }
  0xec   :  { %v418_v46 = vpop.f32.mrf.mxu0 }
  0xed   :  { %356 = vst [vmem:[%s613_s3] sm:$0xff] %v352_v43  ;;  %v419_v47 = vadd.f32 %v418_v46, %v417_v42  ;;  %v341_v48 = vadd.f32 %v340_v45, %v292_v44 }
  0xee   :  { %v420_v49 = vpop.f32.mrf.mxu0 }
  0xef   :  { %v297_v50 = vadd.f32 %v419_v47, %v364_v32  ;;  %v353_v51 = vmax.f32 %v341_v48, 0.0 }
  0xf0   :  { %v421_v52 = vpop.f32.mrf.mxu0 }
  0xf1   :  { %v346_v53 = vadd.f32 %v451_v34, %v297_v50  ;;  %357 = vst [vmem:[%s613_s3 + $0x8] sm:$0xff] %v353_v51  ;;  %v422_v54 = vadd.f32 %v421_v52, %v420_v49 }
  0xf3   :  { %v354_v55 = vmax.f32 %v346_v53, 0.0  ;;  %v300_v56 = vadd.f32 %v422_v54, %v364_v32 }
  0xf5   :  { %358 = vst [vmem:[%s613_s3 + $0x10] sm:$0xff] %v354_v55  ;;  %v349_v57 = vadd.f32 %v452_v41, %v300_v56 }
  0xf7   :  { %v355_v58 = vmax.f32 %v349_v57, 0.0 }
  0xf9   :  { %359 = vst [vmem:[%s613_s3 + $0x18] sm:$0xff] %v355_v58 }

// kernel: _lambda_.35
= control target key start
LH: loop header
LB: loop body
LE: loop exit
PB: predicated region body
PF: predicated region fallthrough
CT: control target
= control target key end

     0   :  { %s279_s1 = inlined_call_operand.vmem [shape: bf16[128,128], index: 1, kind: input, shape index: {}]   ;;  %s280_s0 = inlined_call_operand.vmem [shape: bf16[32,128], index: 0, kind: input, shape index: {}]   ;;  %s281_s2 = inlined_call_operand.vmem [shape: f32[1,128], index: 2, kind: input, shape index: {}]   ;;  %s282_s3 = inlined_call_operand.vmem [shape: f32[32,128], index: 3, kind: output, shape index: {}]  }
   0x1   :  { %v204_v0 = vld [vmem:[%s279_s1 + $0x38] sm:$0xff]   ;;  %v205_v1 = vld [vmem:[%s279_s1 + $0x30] sm:$0xff]   ;;  %v206_v2 = vld [vmem:[%s279_s1 + $0x28] sm:$0xff]  }
   0x2   :  { %184 = vmatprep.subr.bf16.mxu0 %v204_v0  ;;  %v207_v3 = vld [vmem:[%s279_s1 + $0x20] sm:$0xff]   ;;  %v208_v5 = vld [vmem:[%s279_s1 + $0x18] sm:$0xff]   ;;  %v209_v6 = vld [vmem:[%s279_s1 + $0x10] sm:$0xff]  }
   0x3   :  { %185 = vmatpush3.bf16.msra.mxu0 %v204_v0  ;;  %v212_v4 = vld [vmem:[%s280_s0] sm:$0xff]   ;;  %v210_v7 = vld [vmem:[%s279_s1 + $0x8] sm:$0xff]  }
   0x4   :  { %186 = vmatprep.subr.bf16.mxu0 %v205_v1  ;;  %200 = vmatprep.mubr.bf16.mxu0 %v212_v4  ;;  %v211_v8 = vld [vmem:[%s279_s1] sm:$0xff]   ;;  %v213_v9 = vld [vmem:[%s280_s0 + $0x8] sm:$0xff]  }
   0x5   :  { %v163_v10 = vld [vmem:[%s281_s2] ss:$0 sm:$0xff] }
   0x7   :  { %187 = vmatpush3.bf16.msra.mxu0 %v205_v1 }
   0x8   :  { %188 = vmatprep.subr.bf16.mxu0 %v206_v2 }
   0xb   :  { %189 = vmatpush3.bf16.msra.mxu0 %v206_v2 }
   0xc   :  { %190 = vmatprep.subr.bf16.mxu0 %v207_v3 }
   0xf   :  { %191 = vmatpush3.bf16.msra.mxu0 %v207_v3 }
  0x10   :  { %192 = vmatprep.subr.bf16.mxu0 %v208_v5 }
  0x13   :  { %193 = vmatpush3.bf16.msra.mxu0 %v208_v5 }
  0x14   :  { %194 = vmatprep.subr.bf16.mxu0 %v209_v6 }
  0x17   :  { %195 = vmatpush3.bf16.msra.mxu0 %v209_v6 }
  0x18   :  { %196 = vmatprep.subr.bf16.mxu0 %v210_v7 }
  0x1b   :  { %197 = vmatpush3.bf16.msra.mxu0 %v210_v7 }
  0x1c   :  { %198 = vmatprep.subr.bf16.mxu0 %v211_v8 }
  0x1f   :  { %199 = vmatpush3.bf16.msra.mxu0 %v211_v8 }
  0x22   :  { %201 = vmatmul.mubr.bf16.vlgmr.msra.gmra.mxu0 %v213_v9 }
  0xe2   :  { %v202_v11 = vpop.f32.mrf.mxu0 }
  0xe3   :  { %v145_v12 = vadd.f32 %v202_v11, %v163_v10 }
  0xe4   :  { %v136_v13 = vpop.f32.mrf.mxu0 }
  0xe5   :  { %v153_v14 = vmax.f32 %v145_v12, 0.0  ;;  %v137_v15 = vadd.f32 %v163_v10, %v136_v13 }
  0xe6   :  { %v203_v16 = vpop.f32.mrf.mxu0 }
  0xe7   :  { %157 = vst [vmem:[%s282_s3 + $0x10] sm:$0xff] %v153_v14  ;;  %v151_v17 = vmax.f32 %v137_v15, 0.0  ;;  %v148_v18 = vadd.f32 %v203_v16, %v163_v10 }
  0xe8   :  { %v139_v19 = vpop.f32.mrf.mxu0 }
  0xe9   :  { %155 = vst [vmem:[%s282_s3] sm:$0xff] %v151_v17  ;;  %v154_v20 = vmax.f32 %v148_v18, 0.0  ;;  %v140_v21 = vadd.f32 %v163_v10, %v139_v19 }
  0xeb   :  { %158 = vst [vmem:[%s282_s3 + $0x18] sm:$0xff] %v154_v20  ;;  %v152_v22 = vmax.f32 %v140_v21, 0.0 }
  0xed   :  { %156 = vst [vmem:[%s282_s3 + $0x8] sm:$0xff] %v152_v22 }

// kernel: _lambda_.45
= control target key start
LH: loop header
LB: loop body
LE: loop exit
PB: predicated region body
PF: predicated region fallthrough
CT: control target
= control target key end

     0   :  { %s671_s12 = smov 0   ;;  %s747_s0 = inlined_call_operand.vmem [shape: bf16[512,128], index: 0, kind: input, shape index: {}]   ;;  %s748_s1 = inlined_call_operand.vmem [shape: bf16[128,128], index: 1, kind: input, shape index: {}]   ;;  %s749_s2 = inlined_call_operand.vmem [shape: f32[1,128], index: 2, kind: input, shape index: {}]   ;;  %s750_s3 = inlined_call_operand.vmem [shape: f32[512,128], index: 3, kind: output, shape index: {}]  }
   0x1 LB: > { %s495_s13 = sadd.s32 4294967295, %s649_s12   ;;  %p499_p0 = scmp.ge.s32.totalorder %s649_s12, 1  ;;  %s649_s12 = sphi %s671_s12, %s13_s12  }
   0x2   : > { %p138_p1 = scmp.lt.s32.totalorder %s649_s12, 5 }
   0x4   : > { %p139_p2 = pnand %p499_p0, %p138_p1 }
   0x5   : > { %s500_s16 = sshll.u32 (!%p139_p2), %s495_s13, 4 }
   0x6   : > { %142 = sbr.rel (%p139_p2) target bundleno = 269 (0x10d), region = 32  ;;  %p163_p3 = scmp.lt.s32.totalorder (!%p139_p2), %s500_s16, 63 }
   0xb   : > { %v595_v0 = vld [vmem:[%s748_s1 + $0x38] sm:$0xff]   ;;  %v596_v1 = vld [vmem:[%s748_s1 + $0x30] sm:$0xff]   ;;  %s752_s16 = smov (!%p163_p3, %s500_s16), 63  ;;  %v597_v2 = vld [vmem:[%s748_s1 + $0x28] sm:$0xff]  }
   0xc   : > { %539 = vmatprep.subr.bf16.mxu0 %v595_v0  ;;  %571 = vmatprep.subr.bf16.mxu1 %v595_v0  ;;  %s501_s21 = sshll.u32 %s752_s16, 2  ;;  %v598_v3 = vld [vmem:[%s748_s1 + $0x20] sm:$0xff]   ;;  %v599_v6 = vld [vmem:[%s748_s1 + $0x18] sm:$0xff]   ;;  %v600_v7 = vld [vmem:[%s748_s1 + $0x10] sm:$0xff]   ;;  %s503_s10 = sshll.u32 %s752_s16, 3 }
   0xd   : > { %540 = vmatpush3.bf16.msra.mxu0 %v595_v0  ;;  %579 = vmatpush3.bf16.msra.mxu1 %v595_v0  ;;  %s694_s24 = scalar_lea.vmem %s747_s0, %s501_s21  ;;  %v601_v8 = vld [vmem:[%s748_s1 + $0x8] sm:$0xff]   ;;  %v602_v9 = vld [vmem:[%s748_s1] sm:$0xff]   ;;  %s726_s14 = scalar_lea.vmem %s750_s3, %s503_s10 }
   0xe   : > { %541 = vmatprep.subr.bf16.mxu0 %v596_v1  ;;  %572 = vmatprep.subr.bf16.mxu1 %v596_v1  ;;  %v603_v4 = vld [vmem:[%s694_s24] sm:$0xff]   ;;  %v605_v10 = vld [vmem:[%s694_s24 + $0x8] sm:$0xff]   ;;  %v607_v12 = vld [vmem:[%s694_s24 + $0x10] sm:$0xff]  }
   0xf   : > { %v604_v5 = vld [vmem:[%s694_s24 + $0x20] sm:$0xff]   ;;  %555 = vmatprep.mubr.bf16.mxu0 %v603_v4  ;;  %v606_v11 = vld [vmem:[%s694_s24 + $0x28] sm:$0xff]   ;;  %v608_v13 = vld [vmem:[%s694_s24 + $0x30] sm:$0xff]  }
  0x10   : > { %563 = vmatprep.mubr.bf16.mxu1 %v604_v5  ;;  %v609_v14 = vld [vmem:[%s694_s24 + $0x18] sm:$0xff]   ;;  %v504_v16 = vld [vmem:[%s749_s2] ss:$0 sm:$0xff] }
  0x11   : > { %542 = vmatpush3.bf16.msra.mxu0 %v596_v1  ;;  %580 = vmatpush3.bf16.msra.mxu1 %v596_v1  ;;  %v610_v15 = vld [vmem:[%s694_s24 + $0x38] sm:$0xff]  }
  0x12   : > { %543 = vmatprep.subr.bf16.mxu0 %v597_v2  ;;  %573 = vmatprep.subr.bf16.mxu1 %v597_v2 }
  0x15   : > { %544 = vmatpush3.bf16.msra.mxu0 %v597_v2  ;;  %581 = vmatpush3.bf16.msra.mxu1 %v597_v2 }
  0x16   : > { %545 = vmatprep.subr.bf16.mxu0 %v598_v3  ;;  %574 = vmatprep.subr.bf16.mxu1 %v598_v3 }
  0x19   : > { %546 = vmatpush3.bf16.msra.mxu0 %v598_v3  ;;  %582 = vmatpush3.bf16.msra.mxu1 %v598_v3 }
  0x1a   : > { %547 = vmatprep.subr.bf16.mxu0 %v599_v6  ;;  %575 = vmatprep.subr.bf16.mxu1 %v599_v6 }
  0x1d   : > { %548 = vmatpush3.bf16.msra.mxu0 %v599_v6  ;;  %583 = vmatpush3.bf16.msra.mxu1 %v599_v6 }
  0x1e   : > { %549 = vmatprep.subr.bf16.mxu0 %v600_v7  ;;  %576 = vmatprep.subr.bf16.mxu1 %v600_v7 }
  0x21   : > { %550 = vmatpush3.bf16.msra.mxu0 %v600_v7  ;;  %584 = vmatpush3.bf16.msra.mxu1 %v600_v7 }
  0x22   : > { %551 = vmatprep.subr.bf16.mxu0 %v601_v8  ;;  %577 = vmatprep.subr.bf16.mxu1 %v601_v8 }
  0x25   : > { %552 = vmatpush3.bf16.msra.mxu0 %v601_v8  ;;  %585 = vmatpush3.bf16.msra.mxu1 %v601_v8 }
  0x26   : > { %553 = vmatprep.subr.bf16.mxu0 %v602_v9  ;;  %578 = vmatprep.subr.bf16.mxu1 %v602_v9 }
  0x29   : > { %554 = vmatpush3.bf16.msra.mxu0 %v602_v9  ;;  %586 = vmatpush3.bf16.msra.mxu1 %v602_v9 }
  0x2c   : > { %556 = vmatmul.mubr.bf16.vlgmr.msra.gmra.mxu0 %v605_v10  ;;  %564 = vmatmul.mubr.bf16.vlgmr.msra.gmra.mxu1 %v606_v11 }
  0x2d   : > { %559 = vmatprep.mubr.bf16.mxu0 %v607_v12  ;;  %567 = vmatprep.mubr.bf16.mxu1 %v608_v13 }
  0x34   : > { %560 = vmatmul.mubr.bf16.gmra.mxu0 %v609_v14  ;;  %568 = vmatmul.mubr.bf16.gmra.mxu1 %v610_v15 }
  0xec   : > { %v557_v17 = vpop.f32.mrf.mxu0  ;;  %v565_v18 = vpop.f32.mrf.mxu1 }
  0xed   : > { %v353_v19 = vadd.f32 %v557_v17, %v504_v16  ;;  %v385_v20 = vadd.f32 %v565_v18, %v504_v16 }
  0xee   : > { %v344_v21 = vpop.f32.mrf.mxu0  ;;  %v376_v22 = vpop.f32.mrf.mxu1 }
  0xef   : > { %611 = vtanh.f32 %v353_v19  ;;  %v345_v23 = vadd.f32 %v504_v16, %v344_v21  ;;  %v377_v24 = vadd.f32 %v504_v16, %v376_v22 }
  0xf0   : > { %613 = vtanh.f32 %v385_v20  ;;  %v558_v25 = vpop.f32.mrf.mxu0  ;;  %v566_v26 = vpop.f32.mrf.mxu1 }
  0xf1   : > { %615 = vtanh.f32 %v345_v23  ;;  %v356_v27 = vadd.f32 %v558_v25, %v504_v16  ;;  %v388_v28 = vadd.f32 %v566_v26, %v504_v16 }
  0xf2   : > { %617 = vtanh.f32 %v377_v24  ;;  %v347_v29 = vpop.f32.mrf.mxu0  ;;  %v379_v30 = vpop.f32.mrf.mxu1 }
  0xf3   : > { %619 = vtanh.f32 %v356_v27  ;;  %v348_v31 = vadd.f32 %v504_v16, %v347_v29  ;;  %v380_v32 = vadd.f32 %v504_v16, %v379_v30 }
  0xf4   : > { %621 = vtanh.f32 %v388_v28  ;;  %v561_v33 = vpop.f32.mrf.mxu0  ;;  %v569_v34 = vpop.f32.mrf.mxu1 }
  0xf5   : > { %623 = vtanh.f32 %v348_v31  ;;  %v369_v35 = vadd.f32 %v561_v33, %v504_v16  ;;  %v401_v36 = vadd.f32 %v569_v34, %v504_v16 }
  0xf6   : > { %625 = vtanh.f32 %v380_v32  ;;  %v360_v37 = vpop.f32.mrf.mxu0  ;;  %v392_v38 = vpop.f32.mrf.mxu1 }
  0xf7   : > { %627 = vtanh.f32 %v369_v35  ;;  %v361_v39 = vadd.f32 %v504_v16, %v360_v37  ;;  %v393_v40 = vadd.f32 %v504_v16, %v392_v38 }
  0xf8   : > { %629 = vtanh.f32 %v401_v36  ;;  %v562_v41 = vpop.f32.mrf.mxu0  ;;  %v570_v42 = vpop.f32.mrf.mxu1 }
  0xf9   : > { %631 = vtanh.f32 %v361_v39  ;;  %v372_v43 = vadd.f32 %v562_v41, %v504_v16  ;;  %v404_v44 = vadd.f32 %v570_v42, %v504_v16 }
  0xfa   : > { %633 = vtanh.f32 %v393_v40  ;;  %v363_v45 = vpop.f32.mrf.mxu0  ;;  %v395_v46 = vpop.f32.mrf.mxu1 }
  0xfb   : > { %635 = vtanh.f32 %v372_v43  ;;  %v364_v47 = vadd.f32 %v504_v16, %v363_v45  ;;  %v396_v48 = vadd.f32 %v504_v16, %v395_v46 }
  0xfc   : > { %v612_v49 = vpop.eup %611  ;;  %637 = vtanh.f32 %v404_v44 }
  0xfd   : > { %v614_v50 = vpop.eup %613  ;;  %425 = vst [vmem:[%s726_s14 + $0x10] sm:$0xff] %v612_v49  ;;  %639 = vtanh.f32 %v364_v47 }
  0xfe   : > { %v616_v51 = vpop.eup %615  ;;  %433 = vst [vmem:[%s726_s14 + $0x50] sm:$0xff] %v614_v50  ;;  %641 = vtanh.f32 %v396_v48 }
  0xff   : > { %v618_v52 = vpop.eup %617  ;;  %423 = vst [vmem:[%s726_s14] sm:$0xff] %v616_v51 }
 0x100   : > { %v620_v53 = vpop.eup %619  ;;  %431 = vst [vmem:[%s726_s14 + $0x40] sm:$0xff] %v618_v52 }
 0x101   : > { %v622_v54 = vpop.eup %621  ;;  %426 = vst [vmem:[%s726_s14 + $0x18] sm:$0xff] %v620_v53 }
 0x102   : > { %v624_v55 = vpop.eup %623  ;;  %434 = vst [vmem:[%s726_s14 + $0x58] sm:$0xff] %v622_v54 }
 0x103   : > { %v626_v56 = vpop.eup %625  ;;  %424 = vst [vmem:[%s726_s14 + $0x8] sm:$0xff] %v624_v55 }
 0x104   : > { %v628_v57 = vpop.eup %627  ;;  %432 = vst [vmem:[%s726_s14 + $0x48] sm:$0xff] %v626_v56 }
 0x105   : > { %v630_v58 = vpop.eup %629  ;;  %429 = vst [vmem:[%s726_s14 + $0x30] sm:$0xff] %v628_v57 }
 0x106   : > { %v632_v59 = vpop.eup %631  ;;  %437 = vst [vmem:[%s726_s14 + $0x70] sm:$0xff] %v630_v58 }
 0x107   : > { %v634_v60 = vpop.eup %633  ;;  %427 = vst [vmem:[%s726_s14 + $0x20] sm:$0xff] %v632_v59 }
 0x108   : > { %v636_v61 = vpop.eup %635  ;;  %435 = vst [vmem:[%s726_s14 + $0x60] sm:$0xff] %v634_v60 }
 0x109   : > { %v638_v62 = vpop.eup %637  ;;  %430 = vst [vmem:[%s726_s14 + $0x38] sm:$0xff] %v636_v61 }
 0x10a   : > { %v640_v63 = vpop.eup %639  ;;  %438 = vst [vmem:[%s726_s14 + $0x78] sm:$0xff] %v638_v62 }
 0x10b   : > { %v642_v0 = vpop.eup %641  ;;  %428 = vst [vmem:[%s726_s14 + $0x28] sm:$0xff] %v640_v63 }
 0x10c   : > { %436 = vst [vmem:[%s726_s14 + $0x68] sm:$0xff] %v642_v0 }
 0x10d PF: > { %s13_s12 = sadd.s32 1, %s649_s12  }
 0x10e   : > { %p10_p4 = scmp.ge.s32.totalorder %s13_s12, 6  }
 0x110   :  { %12 = sbr.rel (!%p10_p4) target bundleno = 1 (0x1), region = 62 }

</bundles_post_ra>
